<compile_context>
chip_gen: v6e
topology: v6e:2x2x1
jax: 0.10.0
libtpu: 0.0.40
codegen_flags: <defaults>
</compile_context>

<pallas_src>
import jax
import jax.numpy as jnp
from jax.experimental import pallas as pl
from jax.experimental.pallas import tpu as pltpu

IN_FEATURES = 20 * 20 * 4          # 1600
HIDDEN = 512
OUT_FEATURES = 4


def _round_up(x, m):
    return ((x + m - 1) // m) * m


def mlp_kernel(x_ref, w1_ref, b1_ref, w2_ref, b2_ref, w3_ref, b3_ref, o_ref):
    # x tile: (TB, 1600) f32 -> cast to bf16 in-kernel (VPU, hidden under MXU).
    # Weights bf16 (VMEM-resident across grid steps); biases f32; f32 MXU accum.
    x = x_ref[...].astype(jnp.bfloat16)
    h1 = jnp.dot(x, w1_ref[...], preferred_element_type=jnp.float32)        # (TB, 512) f32
    h1 = jnp.maximum(h1 + b1_ref[...], 0.0)                                 # f32 elementwise (v5e-safe)
    h2 = jnp.dot(h1.astype(jnp.bfloat16), w2_ref[...],
                 preferred_element_type=jnp.float32)                        # (TB, 512) f32
    h2 = jnp.maximum(h2 + b2_ref[...], 0.0)
    logits = jnp.dot(h2.astype(jnp.bfloat16), w3_ref[...],
                     preferred_element_type=jnp.float32)                    # (TB, 4) f32
    o_ref[...] = (logits + b3_ref[...]).astype(o_ref.dtype)


def prepare_params(params):
    """One-time conversion of f32 params to the kernel's layout/dtypes.

    Do this once at init (or under jit constant folding) — NOT per forward call.
    """
    w1, b1, w2, b2, w3, b3 = params
    return (w1.astype(jnp.bfloat16), b1.astype(jnp.float32),
            w2.astype(jnp.bfloat16), b2.astype(jnp.float32),
            w3.astype(jnp.bfloat16), b3.astype(jnp.float32))


def neural_network_forward(x_nchw, prepared_params):
    """x_nchw: (B, 4, 20, 20) float32.  prepared_params: from prepare_params().

    Returns logits (B, 4) float32.
    """
    w1b, b1, w2b, b2, w3b, b3 = prepared_params
    B = x_nchw.shape[0]
    x_flat = x_nchw.reshape(B, -1)   # row-major flatten == torch.nn.Flatten on NCHW

    # --- batch tiling: up to 512 rows/tile, multiple of 8 sublanes, but keep
    #     >= 2 grid steps when B allows so both v7x TensorCores get work. ---
    TB = min(512, max(8, _round_up(pl.cdiv(B, 2), 8)))
    Bp = _round_up(B, TB)
    if Bp != B:
        x_flat = jnp.pad(x_flat, ((0, Bp - B), (0, 0)))   # tiny; only batch rows

    def const_spec(shape):
        # Weight/bias blocks: full array, same block every grid step -> VMEM-resident.
        return pl.BlockSpec(shape, lambda i: (0, 0))

    weight_bytes = (IN_FEATURES * HIDDEN + HIDDEN * HIDDEN + HIDDEN * OUT_FEATURES) * 2
    cost = pl.CostEstimate(
        flops=2 * Bp * (IN_FEATURES * HIDDEN + HIDDEN * HIDDEN + HIDDEN * OUT_FEATURES),
        transcendentals=0,
        bytes_accessed=(Bp * IN_FEATURES * 4          # x (f32 read)
                        + weight_bytes                # bf16 weights
                        + (2 * HIDDEN + OUT_FEATURES) * 4   # f32 biases
                        + Bp * OUT_FEATURES * 4),     # f32 out write
    )

    out = pl.pallas_call(
        mlp_kernel,
        out_shape=jax.ShapeDtypeStruct((Bp, OUT_FEATURES), jnp.float32),
        grid=(Bp // TB,),
        in_specs=[
            pl.BlockSpec((TB, IN_FEATURES), lambda i: (i, 0)),   # x tile (f32), pipelined
            const_spec((IN_FEATURES, HIDDEN)),                   # w1 (bf16)
            const_spec((1, HIDDEN)),                             # b1 (f32)
            const_spec((HIDDEN, HIDDEN)),                        # w2 (bf16)
            const_spec((1, HIDDEN)),                             # b2 (f32)
            const_spec((HIDDEN, OUT_FEATURES)),                  # w3 (bf16)
            const_spec((1, OUT_FEATURES)),                       # b3 (f32)
        ],
        out_specs=pl.BlockSpec((TB, OUT_FEATURES), lambda i: (i, 0)),
        compiler_params=pltpu.CompilerParams(
            dimension_semantics=("parallel",),          # megacore split on v7x
            vmem_limit_bytes=32 * 1024 * 1024,          # TB=512 f32 tiles fit on v5e too
        ),
        cost_estimate=cost,
    )(x_flat, w1b, b1, w2b, b2, w3b, b3)

    # TODO(synk): for repeated tiny-batch inference, keep weights VMEM-resident
    # across calls (cross-call future) or batch many timesteps per call — the
    # ~2.3 MB weight DMA dominates that regime and no tiling change helps.
    return out[:B] if Bp != B else out


def init_params(key):
    """Deterministic synthetic parameters (PyTorch Linear shapes, stored transposed)."""
    k1, k2, k3, k4, k5, k6 = jax.random.split(key, 6)
    # PyTorch: weight (out, in); we keep (in, out) so the kernel does x @ W.
    w1 = jax.random.normal(k1, (IN_FEATURES, HIDDEN), jnp.float32) * 0.02
    b1 = jax.random.normal(k2, (1, HIDDEN), jnp.float32) * 0.01
    w2 = jax.random.normal(k3, (HIDDEN, HIDDEN), jnp.float32) * 0.02
    b2 = jax.random.normal(k4, (1, HIDDEN), jnp.float32) * 0.01
    w3 = jax.random.normal(k5, (HIDDEN, OUT_FEATURES), jnp.float32) * 0.02
    b3 = jax.random.normal(k6, (1, OUT_FEATURES), jnp.float32) * 0.01
    return w1, b1, w2, b2, w3, b3


def reference_forward(x_nchw, params):
    w1, b1, w2, b2, w3, b3 = params
    x = x_nchw.reshape(x_nchw.shape[0], -1)
    h1 = jnp.maximum(x @ w1 + b1, 0.0)
    h2 = jnp.maximum(h1 @ w2 + b2, 0.0)
    return h2 @ w3 + b3


if __name__ == "__main__":
    key = jax.random.PRNGKey(0)
    k_x, k_p = jax.random.split(key)

    batch = 2
    x = jax.random.normal(k_x, (batch, 4, 20, 20), jnp.float32)  # NCHW game frames
    params = init_params(k_p)
    prepared = prepare_params(params)     # one-time weight cast, hoisted out of forward

    logits = neural_network_forward(x, prepared)
    logits = jax.block_until_ready(logits)

    ref = reference_forward(x, params)
    assert logits.shape == (batch, OUT_FEATURES)
    # bf16 matmul operands with f32 accumulation -> loosened tolerance vs f32 ref.
    assert jnp.allclose(logits, ref, atol=2e-2, rtol=2e-2)

    print("KERNEL_OK")
</pallas_src>

<mosaic_0001>
module attributes {stable_mosaic.version = 11 : i64} {
  func.func @mlp_kernel(%arg0: i32, %arg1: memref<8x1600xf32, #tpu.memory_space<vmem>>, %arg2: memref<1600x512xbf16, #tpu.memory_space<vmem>>, %arg3: memref<1x512xf32, #tpu.memory_space<vmem>>, %arg4: memref<512x512xbf16, #tpu.memory_space<vmem>>, %arg5: memref<1x512xf32, #tpu.memory_space<vmem>>, %arg6: memref<512x4xbf16, #tpu.memory_space<vmem>>, %arg7: memref<1x4xf32, #tpu.memory_space<vmem>>, %arg8: memref<8x4xf32, #tpu.memory_space<vmem>>) attributes {dimension_semantics = [#tpu.dimension_semantics<parallel>], iteration_bounds = array<i64: 1>, scalar_prefetch = 0 : i64, scratch_operands = 0 : i64, tpu.core_type = #tpu.core_type<tc>, window_params = [{transform_indices = @transform_0, window_bounds = array<i64: 8, 1600>}, {pipeline_mode = #tpu.pipeline_mode<synchronous>, transform_indices = @transform_1, window_bounds = array<i64: 1600, 512>}, {pipeline_mode = #tpu.pipeline_mode<synchronous>, transform_indices = @transform_2, window_bounds = array<i64: 1, 512>}, {pipeline_mode = #tpu.pipeline_mode<synchronous>, transform_indices = @transform_3, window_bounds = array<i64: 512, 512>}, {pipeline_mode = #tpu.pipeline_mode<synchronous>, transform_indices = @transform_4, window_bounds = array<i64: 1, 512>}, {pipeline_mode = #tpu.pipeline_mode<synchronous>, transform_indices = @transform_5, window_bounds = array<i64: 512, 4>}, {pipeline_mode = #tpu.pipeline_mode<synchronous>, transform_indices = @transform_6, window_bounds = array<i64: 1, 4>}, {transform_indices = @transform_7, window_bounds = array<i64: 8, 4>}]} {
    %c0 = arith.constant 0 : index
    %c0_0 = arith.constant 0 : index
    %0 = vector.load %arg1[%c0, %c0_0] : memref<8x1600xf32, #tpu.memory_space<vmem>>, vector<8x1600xf32>
    %1 = arith.truncf %0 : vector<8x1600xf32> to vector<8x1600xbf16>
    %c0_1 = arith.constant 0 : index
    %c0_2 = arith.constant 0 : index
    %2 = vector.load %arg2[%c0_1, %c0_2] : memref<1600x512xbf16, #tpu.memory_space<vmem>>, vector<1600x512xbf16>
    %cst = arith.constant dense<0.000000e+00> : vector<8x512xf32>
    %3 = tpu.matmul %1, %2, %cst {dimension_numbers = #tpu.dot_dimension_numbers<[1], [0], [0], [1], [0, 0, 1, 1], [], []>} : vector<8x1600xbf16>, vector<1600x512xbf16>, vector<8x512xf32> -> vector<8x512xf32>
    %c0_3 = arith.constant 0 : index
    %c0_4 = arith.constant 0 : index
    %4 = vector.load %arg3[%c0_3, %c0_4] : memref<1x512xf32, #tpu.memory_space<vmem>>, vector<1x512xf32>
    %5 = vector.broadcast %4 : vector<1x512xf32> to vector<8x512xf32>
    %6 = arith.addf %3, %5 : vector<8x512xf32>
    %cst_5 = arith.constant 0.000000e+00 : f32
    %7 = vector.broadcast %cst_5 : f32 to vector<8x512xf32>
    %8 = arith.maximumf %6, %7 : vector<8x512xf32>
    %9 = arith.truncf %8 : vector<8x512xf32> to vector<8x512xbf16>
    %c0_6 = arith.constant 0 : index
    %c0_7 = arith.constant 0 : index
    %10 = vector.load %arg4[%c0_6, %c0_7] : memref<512x512xbf16, #tpu.memory_space<vmem>>, vector<512x512xbf16>
    %cst_8 = arith.constant dense<0.000000e+00> : vector<8x512xf32>
    %11 = tpu.matmul %9, %10, %cst_8 {dimension_numbers = #tpu.dot_dimension_numbers<[1], [0], [0], [1], [0, 0, 1, 1], [], []>} : vector<8x512xbf16>, vector<512x512xbf16>, vector<8x512xf32> -> vector<8x512xf32>
    %c0_9 = arith.constant 0 : index
    %c0_10 = arith.constant 0 : index
    %12 = vector.load %arg5[%c0_9, %c0_10] : memref<1x512xf32, #tpu.memory_space<vmem>>, vector<1x512xf32>
    %13 = vector.broadcast %12 : vector<1x512xf32> to vector<8x512xf32>
    %14 = arith.addf %11, %13 : vector<8x512xf32>
    %cst_11 = arith.constant 0.000000e+00 : f32
    %15 = vector.broadcast %cst_11 : f32 to vector<8x512xf32>
    %16 = arith.maximumf %14, %15 : vector<8x512xf32>
    %17 = arith.truncf %16 : vector<8x512xf32> to vector<8x512xbf16>
    %c0_12 = arith.constant 0 : index
    %c0_13 = arith.constant 0 : index
    %18 = vector.load %arg6[%c0_12, %c0_13] : memref<512x4xbf16, #tpu.memory_space<vmem>>, vector<512x4xbf16>
    %cst_14 = arith.constant dense<0.000000e+00> : vector<8x4xf32>
    %19 = tpu.matmul %17, %18, %cst_14 {dimension_numbers = #tpu.dot_dimension_numbers<[1], [0], [0], [1], [0, 0, 1, 1], [], []>} : vector<8x512xbf16>, vector<512x4xbf16>, vector<8x4xf32> -> vector<8x4xf32>
    %c0_15 = arith.constant 0 : index
    %c0_16 = arith.constant 0 : index
    %20 = vector.load %arg7[%c0_15, %c0_16] : memref<1x4xf32, #tpu.memory_space<vmem>>, vector<1x4xf32>
    %21 = vector.broadcast %20 : vector<1x4xf32> to vector<8x4xf32>
    %22 = arith.addf %19, %21 : vector<8x4xf32>
    %c0_17 = arith.constant 0 : index
    %c0_18 = arith.constant 0 : index
    %23 = vector.load %arg8[%c0_17, %c0_18] : memref<8x4xf32, #tpu.memory_space<vmem>>, vector<8x4xf32>
    tpu.vector_store %arg8[%c0_17, %c0_18], %22 {strides = array<i32>} : memref<8x4xf32, #tpu.memory_space<vmem>>, vector<8x4xf32>,
    return
  }
  func.func @transform_0(%arg0: i32) -> (i32, i32) {
    %c0_i32 = arith.constant 0 : i32
    %c0_i32_0 = arith.constant 0 : i32
    return %arg0, %c0_i32 : i32, i32
  }
  func.func @transform_1(%arg0: i32) -> (i32, i32) {
    %c0_i32 = arith.constant 0 : i32
    %c0_i32_0 = arith.constant 0 : i32
    %c0_i32_1 = arith.constant 0 : i32
    return %c0_i32, %c0_i32_0 : i32, i32
  }
  func.func @transform_2(%arg0: i32) -> (i32, i32) {
    %c0_i32 = arith.constant 0 : i32
    %c0_i32_0 = arith.constant 0 : i32
    %c0_i32_1 = arith.constant 0 : i32
    return %c0_i32, %c0_i32_0 : i32, i32
  }
  func.func @transform_3(%arg0: i32) -> (i32, i32) {
    %c0_i32 = arith.constant 0 : i32
    %c0_i32_0 = arith.constant 0 : i32
    %c0_i32_1 = arith.constant 0 : i32
    return %c0_i32, %c0_i32_0 : i32, i32
  }
  func.func @transform_4(%arg0: i32) -> (i32, i32) {
    %c0_i32 = arith.constant 0 : i32
    %c0_i32_0 = arith.constant 0 : i32
    %c0_i32_1 = arith.constant 0 : i32
    return %c0_i32, %c0_i32_0 : i32, i32
  }
  func.func @transform_5(%arg0: i32) -> (i32, i32) {
    %c0_i32 = arith.constant 0 : i32
    %c0_i32_0 = arith.constant 0 : i32
    %c0_i32_1 = arith.constant 0 : i32
    return %c0_i32, %c0_i32_0 : i32, i32
  }
  func.func @transform_6(%arg0: i32) -> (i32, i32) {
    %c0_i32 = arith.constant 0 : i32
    %c0_i32_0 = arith.constant 0 : i32
    %c0_i32_1 = arith.constant 0 : i32
    return %c0_i32, %c0_i32_0 : i32, i32
  }
  func.func @transform_7(%arg0: i32) -> (i32, i32) {
    %c0_i32 = arith.constant 0 : i32
    %c0_i32_0 = arith.constant 0 : i32
    return %arg0, %c0_i32 : i32, i32
  }
}

</mosaic_0001>

<bundles_post_ra>
// kernel: tpu_custom_call.1
= control target key start
LH: loop header
LB: loop body
LE: loop exit
PB: predicated region body
PF: predicated region fallthrough
CT: control target
= control target key end

     0   :  { %12 = vsyncpa [#allocation3], 0  ;;  %s6296_s0 = inlined_call_operand.hbm [shape: f32[8,1600], index: 0, kind: input, shape index: {}]   ;;  %s6297_s1 = inlined_call_operand.hbm [shape: bf16[1600,512], index: 1, kind: input, shape index: {}]   ;;  %s6298_s2 = inlined_call_operand.hbm [shape: f32[1,512], index: 2, kind: input, shape index: {}]   ;;  %s6299_s3 = inlined_call_operand.hbm [shape: bf16[512,512], index: 3, kind: input, shape index: {}]   ;;  %s6300_s4 = inlined_call_operand.hbm [shape: f32[1,512], index: 4, kind: input, shape index: {}]   ;;  %s6301_s5 = inlined_call_operand.vmem [shape: bf16[512,4], index: 5, kind: input, shape index: {}]   ;;  %s6302_s6 = inlined_call_operand.hbm [shape: f32[1,4], index: 6, kind: input, shape index: {}]   ;;  %s6303_s7 = inlined_call_operand.vmem [shape: f32[8,4], index: 7, kind: output, shape index: {}]  }
   0x1   :  { %13 = vsyncpa [#allocation5], 0 }
   0x2   :  { %14 = vsyncpa [#allocation8], 0 }
   0x3   :  { %15 = vsyncpa [#allocation11], 0  ;;  %s6019_s24 = smov [#allocation4]  }
   0x4   :  { %s31_s25 = sshll.u32 %s6019_s24, 4  ;;  %s32_s25 = int_to_ptr.vmem [resolvable:$true] %s31_s25 }
   0x5   :  { %s5899_s26 = scalar_lea.vmem %s32_s25, 51200  ;;  %p5904_p1 = scmp.lt.s32.totalorder %s32_s25, %s32_s25 }
   0x6   :  { %p5900_p0 = scmp.ne.s32.totalorder %s32_s25, %s5899_s26  ;;  %p5905_p2 = scmp.lt.s32.totalorder %s5899_s26, %s5899_s26 }
   0x8   :  { %p5906_p3 = por %p5905_p2, %p5904_p1 }
   0xa   :  { %p5907_p4 = pnand %p5906_p3, %p5900_p0 }
   0xc   :  { %5910 = shalt.err (!%p5907_p4)
}
   0xd   :  { %s6020_s27 = smov 256   ;;  %s6021_s28 = smov 16  }
   0xe   :  { %37 = dma.hbm_to_vmem [thread:$0]  %s6297_s1, 51200, %s32_s25, [#allocation5], %s6020_s27, %s6020_s27, %s6021_s28  }
   0xf   :  { %s6022_s8 = smov [#allocation7]   ;;  %s6023_s10 = smov [#allocation2]  }
  0x10   :  { %s53_s9 = sshll.u32 %s6022_s8, 4  ;;  %s22_s11 = sshll.u32 %s6023_s10, 4  ;;  %s54_s9 = int_to_ptr.vmem [resolvable:$true] %s53_s9  ;;  %s23_s11 = int_to_ptr.vmem [resolvable:$true] %s22_s11 }
  0x11   :  { %s5919_s12 = scalar_lea.vmem %s54_s9, 16384  ;;  %p5924_p6 = scmp.lt.s32.totalorder %s54_s9, %s54_s9 }
  0x12   :  { %p5920_p5 = scmp.ne.s32.totalorder %s54_s9, %s5919_s12  ;;  %p5925_p7 = scmp.lt.s32.totalorder %s5919_s12, %s5919_s12 }
  0x14   :  { %p5926_p8 = por %p5925_p7, %p5924_p6 }
  0x16   :  { %p5927_p9 = pnand %p5926_p8, %p5920_p5 }
  0x18   :  { %5930 = shalt.err (!%p5927_p9)
}
  0x19   :  { %59 = dma.hbm_to_vmem [thread:$0]  %s6299_s3, 16384, %s54_s9, [#allocation8], %s6020_s27, %s6020_s27, %s6021_s28  }
  0x1a   :  { %s5939_s15 = scalar_lea.vmem %s23_s11, 1664  ;;  %p5944_p11 = scmp.lt.s32.totalorder %s23_s11, %s23_s11 }
  0x1b   :  { %p5940_p10 = scmp.ne.s32.totalorder %s23_s11, %s5939_s15  ;;  %p5945_p12 = scmp.lt.s32.totalorder %s5939_s15, %s5939_s15 }
  0x1d   :  { %p5946_p13 = por %p5945_p12, %p5944_p11 }
  0x1f   :  { %p5947_p0 = pnand %p5946_p13, %p5940_p10 }
  0x21   :  { %5950 = shalt.err (!%p5947_p0)
}
  0x22   :  { %25 = dma.hbm_to_vmem [thread:$0]  %s6296_s0, 1664, %s23_s11, [#allocation3]  }
  0x23   :  { %s6024_s17 = smov [#allocation6]   ;;  %s6025_s19 = smov [#allocation9]  }
  0x24   :  { %s44_s18 = sshll.u32 %s6024_s17, 4  ;;  %s66_s20 = sshll.u32 %s6025_s19, 4  ;;  %s45_s18 = int_to_ptr.vmem [resolvable:$true] %s44_s18  ;;  %s67_s20 = int_to_ptr.vmem [resolvable:$true] %s66_s20 }
  0x25   :  { %s5959_s21 = scalar_lea.vmem %s45_s18, 64  ;;  %p5964_p2 = scmp.lt.s32.totalorder %s45_s18, %s45_s18 }
  0x26   :  { %p5960_p1 = scmp.ne.s32.totalorder %s45_s18, %s5959_s21  ;;  %p5965_p3 = scmp.lt.s32.totalorder %s5959_s21, %s5959_s21 }
  0x28   :  { %p5966_p4 = por %p5965_p3, %p5964_p2 }
  0x2a   :  { %p5967_p5 = pnand %p5966_p4, %p5960_p1 }
  0x2c   :  { %5970 = shalt.err (!%p5967_p5)
}
  0x2d   :  { %47 = dma.hbm_to_vmem [thread:$0]  %s6298_s2, 64, %s45_s18, [#allocation5]  }
  0x2e   :  { %s5979_s23 = scalar_lea.vmem %s67_s20, 64  ;;  %p5984_p7 = scmp.lt.s32.totalorder %s67_s20, %s67_s20 }
  0x2f   :  { %p5980_p6 = scmp.ne.s32.totalorder %s67_s20, %s5979_s23  ;;  %p5985_p8 = scmp.lt.s32.totalorder %s5979_s23, %s5979_s23 }
  0x31   :  { %p5986_p9 = por %p5985_p8, %p5984_p7 }
  0x33   :  { %p5987_p10 = pnand %p5986_p9, %p5980_p6 }
  0x35   :  { %5990 = shalt.err (!%p5987_p10)
}
  0x36   :  { %69 = dma.hbm_to_vmem [thread:$0]  %s6300_s4, 64, %s67_s20, [#allocation8]  }
  0x37   :  { %s6026_s25 = smov [#allocation10]  }
  0x38   :  { %s78_s26 = sshll.u32 %s6026_s25, 4  ;;  %s79_s26 = int_to_ptr.vmem [resolvable:$true] %s78_s26 }
  0x39   :  { %s5999_s27 = scalar_lea.vmem %s79_s26, 16  ;;  %s6003_s28 = scalar_lea.vmem %s79_s26, 32 }
  0x3a   :  { %p6000_p11 = scmp.ne.s32.totalorder %s79_s26, %s5999_s27  ;;  %p6004_p12 = scmp.lt.s32.totalorder %s79_s26, %s79_s26 }
  0x3b   :  { %p6005_p13 = scmp.lt.s32.totalorder %s6003_s28, %s5999_s27 }
  0x3d   :  { %p6006_p0 = por %p6005_p13, %p6004_p12 }
  0x3f   :  { %p6007_p1 = pnand %p6006_p0, %p6000_p11 }
  0x41   :  { %6010 = shalt.err (!%p6007_p1)
}
  0x42   :  { %81 = dma.hbm_to_vmem [thread:$0]  %s6302_s6, 16, %s79_s26, [#allocation11]  }
  0x43   :  { %6011 = dma.done.wait [#allocation3], 1664  }
  0x44   :  { %6012 = vsyncadd [#allocation3], 4294965632 }
  0x45   :  { %6013 = dma.done.wait [#allocation5], 51264  }
  0x46   :  { %6014 = vsyncadd [#allocation5], 4294916032 }
  0x47   :  { %6015 = dma.done.wait [#allocation8], 16448  }
  0x48   :  { %6016 = vsyncadd [#allocation8], 4294950848 }
  0x49   :  { %6017 = dma.done.wait [#allocation11], 16  }
  0x4a   :  { %6018 = vsyncadd [#allocation11], 4294967280  ;;  %v5066_v0 = vld [vmem:[#allocation4 + $0xe4] ss:$16 sps:$4 sm:$0xff]   ;;  %v5070_v2 = vld [vmem:[#allocation4 + $0xe0] ss:$16 sps:$4 sm:$0xff]  }
  0x4b   :  { %v5068_v1 = vld [vmem:[#allocation4 + $0x2e4] ss:$16 sps:$4 sm:$0xff]   ;;  %2553 = vmatprep.subr.bf16.mxu0 %v5066_v0  ;;  %v5071_v3 = vld [vmem:[#allocation4 + $0x2e0] ss:$16 sps:$4 sm:$0xff]   ;;  %vm2549_vm0 = vcmask 523264   ;;  %vm4440_vm1 = vcmask 31744  }
  0x4c   :  { %2594 = vmatprep.subr.bf16.mxu1 %v5068_v1  ;;  %v5072_v4 = vld [vmem:[#allocation4 + $0xc4] ss:$16 sps:$4 sm:$0xff]   ;;  %2554 = vmatpush1.bf16.msra.mxu0 %v5070_v2  ;;  %v5076_v6 = vld [vmem:[#allocation4 + $0xc0] ss:$16 sps:$4 sm:$0xff]  }
  0x4d   :  { %2595 = vmatpush1.bf16.msra.mxu1 %v5071_v3  ;;  %v5074_v5 = vld [vmem:[#allocation4 + $0x2c4] ss:$16 sps:$4 sm:$0xff]   ;;  %2555 = vmatprep.subr.bf16.mxu0 %v5072_v4  ;;  %v5077_v7 = vld [vmem:[#allocation4 + $0x2c0] ss:$16 sps:$4 sm:$0xff]   ;;  %v101_v4 = vld [vmem:[#allocation2] sm:$0xff] }
  0x4e   :  { %2596 = vmatprep.subr.bf16.mxu1 %v5074_v5  ;;  %v5078_v8 = vld [vmem:[#allocation4 + $0xa4] ss:$16 sps:$4 sm:$0xff]   ;;  %v5082_v10 = vld [vmem:[#allocation4 + $0xa0] ss:$16 sps:$4 sm:$0xff]   ;;  %v103_v5 = vld [vmem:[#allocation2 + $0x10] sm:$0xff] }
  0x4f   :  { %v5080_v9 = vld [vmem:[#allocation4 + $0x2a4] ss:$16 sps:$4 sm:$0xff]   ;;  %v5083_v11 = vld [vmem:[#allocation4 + $0x2a0] ss:$16 sps:$4 sm:$0xff]  }
  0x50   :  { %2556 = vmatpush1.bf16.msra.mxu0 %v5076_v6  ;;  %v5084_v12 = vld [vmem:[#allocation4 + $0x84] ss:$16 sps:$4 sm:$0xff]   ;;  %v5088_v14 = vld [vmem:[#allocation4 + $0x80] ss:$16 sps:$4 sm:$0xff]  }
  0x51   :  { %2597 = vmatpush1.bf16.msra.mxu1 %v5077_v7  ;;  %2557 = vmatprep.subr.bf16.mxu0 %v5078_v8  ;;  %v5086_v13 = vld [vmem:[#allocation4 + $0x284] ss:$16 sps:$4 sm:$0xff]   ;;  %v5089_v15 = vld [vmem:[#allocation4 + $0x280] ss:$16 sps:$4 sm:$0xff]   ;;  %v6092_v8 = vpack.c.bf16 %v101_v4, %v101_v4 }
  0x52   :  { %2598 = vmatprep.subr.bf16.mxu1 %v5080_v9  ;;  %v5090_v16 = vld [vmem:[#allocation4 + $0x64] ss:$16 sps:$4 sm:$0xff]   ;;  %v5094_v18 = vld [vmem:[#allocation4 + $0x60] ss:$16 sps:$4 sm:$0xff]   ;;  %v6094_v9 = vpack.c.bf16 %v103_v5, %v103_v5 }
  0x53   :  { %v5092_v17 = vld [vmem:[#allocation4 + $0x264] ss:$16 sps:$4 sm:$0xff]   ;;  %v5095_v19 = vld [vmem:[#allocation4 + $0x260] ss:$16 sps:$4 sm:$0xff]  }
  0x54   :  { %2558 = vmatpush1.bf16.msra.mxu0 %v5082_v10  ;;  %v5096_v20 = vld [vmem:[#allocation4 + $0x44] ss:$16 sps:$4 sm:$0xff]   ;;  %v5100_v22 = vld [vmem:[#allocation4 + $0x40] ss:$16 sps:$4 sm:$0xff]  }
  0x55   :  { %2599 = vmatpush1.bf16.msra.mxu1 %v5083_v11  ;;  %2559 = vmatprep.subr.bf16.mxu0 %v5084_v12  ;;  %v5098_v21 = vld [vmem:[#allocation4 + $0x244] ss:$16 sps:$4 sm:$0xff]   ;;  %v5101_v23 = vld [vmem:[#allocation4 + $0x240] ss:$16 sps:$4 sm:$0xff]  }
  0x56   :  { %2600 = vmatprep.subr.bf16.mxu1 %v5086_v13  ;;  %v5102_v24 = vld [vmem:[#allocation4 + $0x24] ss:$16 sps:$4 sm:$0xff]   ;;  %v5106_v26 = vld [vmem:[#allocation4 + $0x20] ss:$16 sps:$4 sm:$0xff]  }
  0x57   :  { %v5104_v25 = vld [vmem:[#allocation4 + $0x224] ss:$16 sps:$4 sm:$0xff]   ;;  %v5107_v27 = vld [vmem:[#allocation4 + $0x220] ss:$16 sps:$4 sm:$0xff]  }
  0x58   :  { %2560 = vmatpush1.bf16.msra.mxu0 %v5088_v14  ;;  %v5108_v28 = vld [vmem:[#allocation4 + $0x4] ss:$16 sps:$4 sm:$0xff]   ;;  %v5112_v30 = vld [vmem:[#allocation4] ss:$16 sps:$4 sm:$0xff]  }
  0x59   :  { %2601 = vmatpush1.bf16.msra.mxu1 %v5089_v15  ;;  %2561 = vmatprep.subr.bf16.mxu0 %v5090_v16  ;;  %v5110_v29 = vld [vmem:[#allocation4 + $0x204] ss:$16 sps:$4 sm:$0xff]   ;;  %v5113_v31 = vld [vmem:[#allocation4 + $0x200] ss:$16 sps:$4 sm:$0xff]  }
  0x5a   :  { %2602 = vmatprep.subr.bf16.mxu1 %v5092_v17  ;;  %v5114_v32 = vld [vmem:[#allocation4 + $0x1e4] ss:$16 sps:$4 sm:$0xff]   ;;  %v5118_v34 = vld [vmem:[#allocation4 + $0x1e0] ss:$16 sps:$4 sm:$0xff]  }
  0x5b   :  { %v5116_v33 = vld [vmem:[#allocation4 + $0x3e4] ss:$16 sps:$4 sm:$0xff]   ;;  %v5119_v35 = vld [vmem:[#allocation4 + $0x3e0] ss:$16 sps:$4 sm:$0xff]  }
  0x5c   :  { %2562 = vmatpush1.bf16.msra.mxu0 %v5094_v18  ;;  %v5120_v36 = vld [vmem:[#allocation4 + $0x1c4] ss:$16 sps:$4 sm:$0xff]   ;;  %v5124_v38 = vld [vmem:[#allocation4 + $0x1c0] ss:$16 sps:$4 sm:$0xff]  }
  0x5d   :  { %2603 = vmatpush1.bf16.msra.mxu1 %v5095_v19  ;;  %2563 = vmatprep.subr.bf16.mxu0 %v5096_v20  ;;  %v5122_v37 = vld [vmem:[#allocation4 + $0x3c4] ss:$16 sps:$4 sm:$0xff]   ;;  %v5125_v39 = vld [vmem:[#allocation4 + $0x3c0] ss:$16 sps:$4 sm:$0xff]  }
  0x5e   :  { %2604 = vmatprep.subr.bf16.mxu1 %v5098_v21  ;;  %v5126_v40 = vld [vmem:[#allocation4 + $0x1a4] ss:$16 sps:$4 sm:$0xff]   ;;  %v5130_v42 = vld [vmem:[#allocation4 + $0x1a0] ss:$16 sps:$4 sm:$0xff]  }
  0x5f   :  { %v5128_v41 = vld [vmem:[#allocation4 + $0x3a4] ss:$16 sps:$4 sm:$0xff]   ;;  %v5131_v43 = vld [vmem:[#allocation4 + $0x3a0] ss:$16 sps:$4 sm:$0xff]  }
  0x60   :  { %2564 = vmatpush1.bf16.msra.mxu0 %v5100_v22  ;;  %v5132_v44 = vld [vmem:[#allocation4 + $0x184] ss:$16 sps:$4 sm:$0xff]   ;;  %v5136_v47 = vld [vmem:[#allocation4 + $0x180] ss:$16 sps:$4 sm:$0xff]  }
  0x61   :  { %2605 = vmatpush1.bf16.msra.mxu1 %v5101_v23  ;;  %2565 = vmatprep.subr.bf16.mxu0 %v5102_v24  ;;  %v5134_v45 = vld [vmem:[#allocation4 + $0x384] ss:$16 sps:$4 sm:$0xff]   ;;  %v5137_v48 = vld [vmem:[#allocation4 + $0x380] ss:$16 sps:$4 sm:$0xff]  }
  0x62   :  { %2606 = vmatprep.subr.bf16.mxu1 %v5104_v25  ;;  %v102_v46 = vld [vmem:[#allocation2 + $0x8] sm:$0xff]  ;;  %v104_v50 = vld [vmem:[#allocation2 + $0x18] sm:$0xff] }
  0x63   :  { %v6086_v49 = vpack.c.bf16 %v102_v46, %v102_v46  ;;  %v5138_v51 = vld [vmem:[#allocation4 + $0x164] ss:$16 sps:$4 sm:$0xff]   ;;  %v6088_v52 = vpack.c.bf16 %v104_v50, %v104_v50  ;;  %v5142_v54 = vld [vmem:[#allocation4 + $0x160] ss:$16 sps:$4 sm:$0xff]  }
  0x64   :  { %2566 = vmatpush1.bf16.msra.mxu0 %v5106_v26  ;;  %v5140_v53 = vld [vmem:[#allocation4 + $0x364] ss:$16 sps:$4 sm:$0xff]   ;;  %v5143_v55 = vld [vmem:[#allocation4 + $0x360] ss:$16 sps:$4 sm:$0xff]  }
  0x65   :  { %2607 = vmatpush1.bf16.msra.mxu1 %v5107_v27  ;;  %2567 = vmatprep.subr.bf16.mxu0 %v5108_v28  ;;  %v5144_v56 = vld [vmem:[#allocation4 + $0x144] ss:$16 sps:$4 sm:$0xff]   ;;  %v5148_v58 = vld [vmem:[#allocation4 + $0x140] ss:$16 sps:$4 sm:$0xff]  }
  0x66   :  { %2608 = vmatprep.subr.bf16.mxu1 %v5110_v29  ;;  %2585 = vmatprep.mubr.bf16.mxu0 %v6086_v49  ;;  %v5146_v57 = vld [vmem:[#allocation4 + $0x344] ss:$16 sps:$4 sm:$0xff]   ;;  %v5149_v59 = vld [vmem:[#allocation4 + $0x340] ss:$16 sps:$4 sm:$0xff]  }
  0x67   :  { %2626 = vmatprep.mubr.bf16.mxu1 %v6088_v52  ;;  %v5150_v60 = vld [vmem:[#allocation4 + $0x124] ss:$16 sps:$4 sm:$0xff]   ;;  %v5154_v62 = vld [vmem:[#allocation4 + $0x120] ss:$16 sps:$4 sm:$0xff]  }
  0x68   :  { %2568 = vmatpush1.bf16.msra.mxu0 %v5112_v30  ;;  %v5152_v61 = vld [vmem:[#allocation4 + $0x324] ss:$16 sps:$4 sm:$0xff]   ;;  %v5155_v63 = vld [vmem:[#allocation4 + $0x320] ss:$16 sps:$4 sm:$0xff]  }
  0x69   :  { %2609 = vmatpush1.bf16.msra.mxu1 %v5113_v31  ;;  %2569 = vmatprep.subr.bf16.mxu0 %v5114_v32  ;;  %v5156_v0 = vld [vmem:[#allocation4 + $0x104] ss:$16 sps:$4 sm:$0xff]   ;;  %v5160_v2 = vld [vmem:[#allocation4 + $0x100] ss:$16 sps:$4 sm:$0xff]  }
  0x6a   :  { %2610 = vmatprep.subr.bf16.mxu1 %v5116_v33  ;;  %v5158_v1 = vld [vmem:[#allocation4 + $0x304] ss:$16 sps:$4 sm:$0xff]   ;;  %v5161_v3 = vld [vmem:[#allocation4 + $0x300] ss:$16 sps:$4 sm:$0xff]  }
  0x6b   :  { %v5164_v6 = vld [vmem:[#allocation4 + $0x4e4] ss:$16 sps:$4 sm:$0xff]   ;;  %v5162_v10 = vld [vmem:[#allocation4 + $0x4e0] ss:$16 sps:$4 sm:$0xff]  }
  0x6c   :  { %2570 = vmatpush2.bf16.msra.mxu0 %v5118_v34  ;;  %v5167_v7 = vld [vmem:[#allocation4 + $0x6e4] ss:$16 sps:$4 sm:$0xff]   ;;  %v5165_v11 = vld [vmem:[#allocation4 + $0x6e0] ss:$16 sps:$4 sm:$0xff]  }
  0x6d   :  { %2611 = vmatpush2.bf16.msra.mxu1 %v5119_v35  ;;  %2571 = vmatprep.subr.bf16.mxu0 %v5120_v36  ;;  %v5170_v12 = vld [vmem:[#allocation4 + $0x4c4] ss:$16 sps:$4 sm:$0xff]   ;;  %v5168_v14 = vld [vmem:[#allocation4 + $0x4c0] ss:$16 sps:$4 sm:$0xff]  }
  0x6e   :  { %2612 = vmatprep.subr.bf16.mxu1 %v5122_v37  ;;  %v5173_v13 = vld [vmem:[#allocation4 + $0x6c4] ss:$16 sps:$4 sm:$0xff]   ;;  %v5171_v15 = vld [vmem:[#allocation4 + $0x6c0] ss:$16 sps:$4 sm:$0xff]  }
  0x6f   :  { %v5176_v16 = vld [vmem:[#allocation4 + $0x4a4] ss:$16 sps:$4 sm:$0xff]   ;;  %v5174_v18 = vld [vmem:[#allocation4 + $0x4a0] ss:$16 sps:$4 sm:$0xff]  }
  0x70   :  { %2572 = vmatpush2.bf16.msra.mxu0 %v5124_v38  ;;  %v5179_v17 = vld [vmem:[#allocation4 + $0x6a4] ss:$16 sps:$4 sm:$0xff]   ;;  %v5177_v19 = vld [vmem:[#allocation4 + $0x6a0] ss:$16 sps:$4 sm:$0xff]  }
  0x71   :  { %2613 = vmatpush2.bf16.msra.mxu1 %v5125_v39  ;;  %2573 = vmatprep.subr.bf16.mxu0 %v5126_v40  ;;  %v5182_v20 = vld [vmem:[#allocation4 + $0x484] ss:$16 sps:$4 sm:$0xff]   ;;  %v5180_v22 = vld [vmem:[#allocation4 + $0x480] ss:$16 sps:$4 sm:$0xff]  }
  0x72   :  { %2614 = vmatprep.subr.bf16.mxu1 %v5128_v41  ;;  %v5185_v21 = vld [vmem:[#allocation4 + $0x684] ss:$16 sps:$4 sm:$0xff]   ;;  %v5183_v23 = vld [vmem:[#allocation4 + $0x680] ss:$16 sps:$4 sm:$0xff]  }
  0x73   :  { %v5188_v24 = vld [vmem:[#allocation4 + $0x464] ss:$16 sps:$4 sm:$0xff]   ;;  %v5186_v26 = vld [vmem:[#allocation4 + $0x460] ss:$16 sps:$4 sm:$0xff]  }
  0x74   :  { %2574 = vmatpush2.bf16.msra.mxu0 %v5130_v42  ;;  %v5191_v25 = vld [vmem:[#allocation4 + $0x664] ss:$16 sps:$4 sm:$0xff]   ;;  %v5189_v27 = vld [vmem:[#allocation4 + $0x660] ss:$16 sps:$4 sm:$0xff]  }
  0x75   :  { %2615 = vmatpush2.bf16.msra.mxu1 %v5131_v43  ;;  %2575 = vmatprep.subr.bf16.mxu0 %v5132_v44  ;;  %v5194_v28 = vld [vmem:[#allocation4 + $0x444] ss:$16 sps:$4 sm:$0xff]   ;;  %v5192_v30 = vld [vmem:[#allocation4 + $0x440] ss:$16 sps:$4 sm:$0xff]  }
  0x76   :  { %2616 = vmatprep.subr.bf16.mxu1 %v5134_v45  ;;  %v5197_v29 = vld [vmem:[#allocation4 + $0x644] ss:$16 sps:$4 sm:$0xff]   ;;  %v5195_v31 = vld [vmem:[#allocation4 + $0x640] ss:$16 sps:$4 sm:$0xff]  }
  0x77   :  { %v5200_v32 = vld [vmem:[#allocation4 + $0x424] ss:$16 sps:$4 sm:$0xff]   ;;  %v5198_v35 = vld [vmem:[#allocation4 + $0x420] ss:$16 sps:$4 sm:$0xff]  }
  0x78   :  { %2576 = vmatpush2.bf16.msra.mxu0 %v5136_v47  ;;  %v5203_v33 = vld [vmem:[#allocation4 + $0x624] ss:$16 sps:$4 sm:$0xff]   ;;  %v5201_v36 = vld [vmem:[#allocation4 + $0x620] ss:$16 sps:$4 sm:$0xff]  }
  0x79   :  { %2617 = vmatpush2.bf16.msra.mxu1 %v5137_v48  ;;  %2577 = vmatprep.subr.bf16.mxu0 %v5138_v51  ;;  %v106_v34 = vld [vmem:[#allocation2 + $0x28] sm:$0xff]  ;;  %v108_v38 = vld [vmem:[#allocation2 + $0x38] sm:$0xff] }
  0x7a   :  { %2618 = vmatprep.subr.bf16.mxu1 %v5140_v53  ;;  %v6098_v37 = vpack.c.bf16 %v106_v34, %v106_v34  ;;  %v5206_v39 = vld [vmem:[#allocation4 + $0x404] ss:$16 sps:$4 sm:$0xff]   ;;  %v6100_v40 = vpack.c.bf16 %v108_v38, %v108_v38  ;;  %v5204_v42 = vld [vmem:[#allocation4 + $0x400] ss:$16 sps:$4 sm:$0xff]  }
  0x7b   :  { %v5209_v41 = vld [vmem:[#allocation4 + $0x604] ss:$16 sps:$4 sm:$0xff]   ;;  %v5207_v43 = vld [vmem:[#allocation4 + $0x600] ss:$16 sps:$4 sm:$0xff]  }
  0x7c   :  { %2578 = vmatpush2.bf16.msra.mxu0 %v5142_v54  ;;  %v5212_v44 = vld [vmem:[#allocation4 + $0x5e4] ss:$16 sps:$4 sm:$0xff]   ;;  %v5210_v46 = vld [vmem:[#allocation4 + $0x5e0] ss:$16 sps:$4 sm:$0xff]  }
  0x7d   :  { %2619 = vmatpush2.bf16.msra.mxu1 %v5143_v55  ;;  %2579 = vmatprep.subr.bf16.mxu0 %v5144_v56  ;;  %v5215_v45 = vld [vmem:[#allocation4 + $0x7e4] ss:$16 sps:$4 sm:$0xff]   ;;  %v5213_v47 = vld [vmem:[#allocation4 + $0x7e0] ss:$16 sps:$4 sm:$0xff]  }
  0x7e   :  { %2620 = vmatprep.subr.bf16.mxu1 %v5146_v57  ;;  %v5218_v48 = vld [vmem:[#allocation4 + $0x5c4] ss:$16 sps:$4 sm:$0xff]   ;;  %v5216_v51 = vld [vmem:[#allocation4 + $0x5c0] ss:$16 sps:$4 sm:$0xff]  }
  0x7f   :  { %v5221_v50 = vld [vmem:[#allocation4 + $0x7c4] ss:$16 sps:$4 sm:$0xff]   ;;  %v5219_v53 = vld [vmem:[#allocation4 + $0x7c0] ss:$16 sps:$4 sm:$0xff]  }
  0x80   :  { %2580 = vmatpush2.bf16.msra.mxu0 %v5148_v58  ;;  %v5224_v54 = vld [vmem:[#allocation4 + $0x5a4] ss:$16 sps:$4 sm:$0xff]   ;;  %v5222_v56 = vld [vmem:[#allocation4 + $0x5a0] ss:$16 sps:$4 sm:$0xff]  }
  0x81   :  { %2621 = vmatpush2.bf16.msra.mxu1 %v5149_v59  ;;  %2581 = vmatprep.subr.bf16.mxu0 %v5150_v60  ;;  %v5227_v55 = vld [vmem:[#allocation4 + $0x7a4] ss:$16 sps:$4 sm:$0xff]   ;;  %v5225_v57 = vld [vmem:[#allocation4 + $0x7a0] ss:$16 sps:$4 sm:$0xff]  }
  0x82   :  { %2622 = vmatprep.subr.bf16.mxu1 %v5152_v61  ;;  %v5230_v58 = vld [vmem:[#allocation4 + $0x584] ss:$16 sps:$4 sm:$0xff]   ;;  %v5228_v60 = vld [vmem:[#allocation4 + $0x580] ss:$16 sps:$4 sm:$0xff]  }
  0x83   :  { %v5233_v59 = vld [vmem:[#allocation4 + $0x784] ss:$16 sps:$4 sm:$0xff]   ;;  %v5231_v61 = vld [vmem:[#allocation4 + $0x780] ss:$16 sps:$4 sm:$0xff]  }
  0x84   :  { %2582 = vmatpush2.bf16.msra.mxu0 %v5154_v62  ;;  %v5236_v62 = vld [vmem:[#allocation4 + $0x564] ss:$16 sps:$4 sm:$0xff]   ;;  %v5240_v4 = vld [vmem:[#allocation4 + $0x540] ss:$16 sps:$4 sm:$0xff]  }
  0x85   :  { %2623 = vmatpush2.bf16.msra.mxu1 %v5155_v63  ;;  %2583 = vmatprep.subr.bf16.mxu0 %v5156_v0  ;;  %v5239_v63 = vld [vmem:[#allocation4 + $0x764] ss:$16 sps:$4 sm:$0xff]   ;;  %v5234_v0 = vld [vmem:[#allocation4 + $0x560] ss:$16 sps:$4 sm:$0xff]  }
  0x86   :  { %2624 = vmatprep.subr.bf16.mxu1 %v5158_v1  ;;  %v5237_v1 = vld [vmem:[#allocation4 + $0x760] ss:$16 sps:$4 sm:$0xff]   ;;  %v5281_v38 = vld [vmem:[#allocation4 + $0xa84] ss:$16 sps:$4 sm:$0xff]  }
  0x87   :  { %v5243_v5 = vld [vmem:[#allocation4 + $0x740] ss:$16 sps:$4 sm:$0xff]  }
  0x88   :  { %2584 = vmatpush2.bf16.msra.mxu0 %v5160_v2  ;;  %v5242_v2 = vld [vmem:[#allocation4 + $0x544] ss:$16 sps:$4 sm:$0xff]   ;;  %v5270_v34 = vld [vmem:[#allocation4 + $0x8a0] ss:$16 sps:$4 sm:$0xff]  }
  0x89   :  { %2625 = vmatpush2.bf16.msra.mxu1 %v5161_v3  ;;  %2635 = vmatprep.subr.bf16.mxu0 %v5164_v6  ;;  %v5245_v3 = vld [vmem:[#allocation4 + $0x744] ss:$16 sps:$4 sm:$0xff]  }
  0x8a   :  { %2676 = vmatprep.subr.bf16.mxu1 %v5167_v7  ;;  %v5248_v6 = vld [vmem:[#allocation4 + $0x524] ss:$16 sps:$4 sm:$0xff]  }
  0x8b   :  { %2586 = vmatmul.mubr.bf16.vlgmr.msra.gmra.mxu0 %v6092_v8  ;;  %v5251_v7 = vld [vmem:[#allocation4 + $0x724] ss:$16 sps:$4 sm:$0xff]  }
  0x8c   :  { %2627 = vmatmul.mubr.bf16.vlgmr.msra.gmra.mxu1 %v6094_v9  ;;  %2636 = vmatpush1.bf16.msra.mxu0 %v5162_v10  ;;  %v5246_v10 = vld [vmem:[#allocation4 + $0x520] ss:$16 sps:$4 sm:$0xff]  }
  0x8d   :  { %2677 = vmatpush1.bf16.msra.mxu1 %v5165_v11  ;;  %2637 = vmatprep.subr.bf16.mxu0 %v5170_v12  ;;  %v5249_v11 = vld [vmem:[#allocation4 + $0x720] ss:$16 sps:$4 sm:$0xff]   ;;  %v5254_v12 = vld [vmem:[#allocation4 + $0x504] ss:$16 sps:$4 sm:$0xff]  }
  0x8e   :  { %2678 = vmatprep.subr.bf16.mxu1 %v5173_v13  ;;  %2667 = vmatprep.mubr.bf16.mxu0 %v6098_v37  ;;  %v5257_v13 = vld [vmem:[#allocation4 + $0x704] ss:$16 sps:$4 sm:$0xff]  }
  0x8f   :  { %2708 = vmatprep.mubr.bf16.mxu1 %v6100_v40 }
  0x90   :  { %2638 = vmatpush1.bf16.msra.mxu0 %v5168_v14  ;;  %v5252_v14 = vld [vmem:[#allocation4 + $0x500] ss:$16 sps:$4 sm:$0xff]  }
  0x91   :  { %2679 = vmatpush1.bf16.msra.mxu1 %v5171_v15  ;;  %2639 = vmatprep.subr.bf16.mxu0 %v5176_v16  ;;  %v5255_v15 = vld [vmem:[#allocation4 + $0x700] ss:$16 sps:$4 sm:$0xff]   ;;  %v105_v16 = vld [vmem:[#allocation2 + $0x20] sm:$0xff] }
  0x92   :  { %2680 = vmatprep.subr.bf16.mxu1 %v5179_v17  ;;  %v107_v17 = vld [vmem:[#allocation2 + $0x30] sm:$0xff] }
  0x94   :  { %2640 = vmatpush1.bf16.msra.mxu0 %v5174_v18  ;;  %v5260_v18 = vld [vmem:[#allocation4 + $0x8e4] ss:$16 sps:$4 sm:$0xff]  }
  0x95   :  { %2681 = vmatpush1.bf16.msra.mxu1 %v5177_v19  ;;  %2641 = vmatprep.subr.bf16.mxu0 %v5182_v20  ;;  %v5263_v19 = vld [vmem:[#allocation4 + $0xae4] ss:$16 sps:$4 sm:$0xff]   ;;  %v6104_v20 = vpack.c.bf16 %v105_v16, %v105_v16  ;;  %v5330_v16 = vld [vmem:[#allocation4 + $0x960] ss:$16 sps:$4 sm:$0xff]  }
  0x96   :  { %2682 = vmatprep.subr.bf16.mxu1 %v5185_v21  ;;  %v6106_v21 = vpack.c.bf16 %v107_v17, %v107_v17  ;;  %v5333_v17 = vld [vmem:[#allocation4 + $0xb60] ss:$16 sps:$4 sm:$0xff]  }
  0x98   :  { %2642 = vmatpush1.bf16.msra.mxu0 %v5180_v22  ;;  %v5258_v22 = vld [vmem:[#allocation4 + $0x8e0] ss:$16 sps:$4 sm:$0xff]  }
  0x99   :  { %2683 = vmatpush1.bf16.msra.mxu1 %v5183_v23  ;;  %2643 = vmatprep.subr.bf16.mxu0 %v5188_v24  ;;  %v5261_v23 = vld [vmem:[#allocation4 + $0xae0] ss:$16 sps:$4 sm:$0xff]   ;;  %v5266_v24 = vld [vmem:[#allocation4 + $0x8c4] ss:$16 sps:$4 sm:$0xff]  }
  0x9a   :  { %2684 = vmatprep.subr.bf16.mxu1 %v5191_v25  ;;  %v5269_v25 = vld [vmem:[#allocation4 + $0xac4] ss:$16 sps:$4 sm:$0xff]  }
  0x9c   :  { %2644 = vmatpush1.bf16.msra.mxu0 %v5186_v26  ;;  %v110_v26 = vld [vmem:[#allocation2 + $0x48] sm:$0xff] }
  0x9d   :  { %2685 = vmatpush1.bf16.msra.mxu1 %v5189_v27  ;;  %2645 = vmatprep.subr.bf16.mxu0 %v5194_v28  ;;  %v5264_v27 = vld [vmem:[#allocation4 + $0x8c0] ss:$16 sps:$4 sm:$0xff]  }
  0x9e   :  { %2686 = vmatprep.subr.bf16.mxu1 %v5197_v29  ;;  %v5267_v28 = vld [vmem:[#allocation4 + $0xac0] ss:$16 sps:$4 sm:$0xff]   ;;  %v6110_v29 = vpack.c.bf16 %v110_v26, %v110_v26 }
  0x9f   :  { %v5342_v26 = vld [vmem:[#allocation4 + $0x920] ss:$16 sps:$4 sm:$0xff]  }
  0xa0   :  { %2646 = vmatpush1.bf16.msra.mxu0 %v5192_v30  ;;  %v112_v30 = vld [vmem:[#allocation2 + $0x58] sm:$0xff] }
  0xa1   :  { %2687 = vmatpush1.bf16.msra.mxu1 %v5195_v31  ;;  %2647 = vmatprep.subr.bf16.mxu0 %v5200_v32  ;;  %v5272_v31 = vld [vmem:[#allocation4 + $0x8a4] ss:$16 sps:$4 sm:$0xff]   ;;  %v6112_v32 = vpack.c.bf16 %v112_v30, %v112_v30 }
  0xa2   :  { %2688 = vmatprep.subr.bf16.mxu1 %v5203_v33  ;;  %v5275_v33 = vld [vmem:[#allocation4 + $0xaa4] ss:$16 sps:$4 sm:$0xff]  }
  0xa3   :  { %v5353_v30 = vld [vmem:[#allocation4 + $0xb04] ss:$16 sps:$4 sm:$0xff]  }
  0xa4   :  { %2648 = vmatpush1.bf16.msra.mxu0 %v5198_v35  ;;  %v5273_v35 = vld [vmem:[#allocation4 + $0xaa0] ss:$16 sps:$4 sm:$0xff]  }
  0xa5   :  { %2689 = vmatpush1.bf16.msra.mxu1 %v5201_v36  ;;  %2649 = vmatprep.subr.bf16.mxu0 %v5206_v39  ;;  %v5278_v36 = vld [vmem:[#allocation4 + $0x884] ss:$16 sps:$4 sm:$0xff]   ;;  %v5276_v39 = vld [vmem:[#allocation4 + $0x880] ss:$16 sps:$4 sm:$0xff]  }
  0xa6   :  { %2690 = vmatprep.subr.bf16.mxu1 %v5209_v41  ;;  %v5279_v41 = vld [vmem:[#allocation4 + $0xa80] ss:$16 sps:$4 sm:$0xff]  }
  0xa8   :  { %2650 = vmatpush1.bf16.msra.mxu0 %v5204_v42  ;;  %v5284_v42 = vld [vmem:[#allocation4 + $0x864] ss:$16 sps:$4 sm:$0xff]  }
  0xa9   :  { %2691 = vmatpush1.bf16.msra.mxu1 %v5207_v43  ;;  %2651 = vmatprep.subr.bf16.mxu0 %v5212_v44  ;;  %v5287_v43 = vld [vmem:[#allocation4 + $0xa64] ss:$16 sps:$4 sm:$0xff]   ;;  %v5282_v44 = vld [vmem:[#allocation4 + $0x860] ss:$16 sps:$4 sm:$0xff]  }
  0xaa   :  { %2692 = vmatprep.subr.bf16.mxu1 %v5215_v45  ;;  %v5285_v45 = vld [vmem:[#allocation4 + $0xa60] ss:$16 sps:$4 sm:$0xff]  }
  0xac   :  { %2652 = vmatpush2.bf16.msra.mxu0 %v5210_v46  ;;  %v5290_v46 = vld [vmem:[#allocation4 + $0x844] ss:$16 sps:$4 sm:$0xff]  }
  0xad   :  { %2693 = vmatpush2.bf16.msra.mxu1 %v5213_v47  ;;  %2653 = vmatprep.subr.bf16.mxu0 %v5218_v48  ;;  %v5293_v47 = vld [vmem:[#allocation4 + $0xa44] ss:$16 sps:$4 sm:$0xff]   ;;  %v5288_v48 = vld [vmem:[#allocation4 + $0x840] ss:$16 sps:$4 sm:$0xff]  }
  0xae   :  { %2694 = vmatprep.subr.bf16.mxu1 %v5221_v50  ;;  %v5291_v50 = vld [vmem:[#allocation4 + $0xa40] ss:$16 sps:$4 sm:$0xff]  }
  0xb0   :  { %2654 = vmatpush2.bf16.msra.mxu0 %v5216_v51  ;;  %v5296_v51 = vld [vmem:[#allocation4 + $0x824] ss:$16 sps:$4 sm:$0xff]  }
  0xb1   :  { %2695 = vmatpush2.bf16.msra.mxu1 %v5219_v53  ;;  %2655 = vmatprep.subr.bf16.mxu0 %v5224_v54  ;;  %v5299_v53 = vld [vmem:[#allocation4 + $0xa24] ss:$16 sps:$4 sm:$0xff]   ;;  %v5294_v54 = vld [vmem:[#allocation4 + $0x820] ss:$16 sps:$4 sm:$0xff]  }
  0xb2   :  { %2696 = vmatprep.subr.bf16.mxu1 %v5227_v55  ;;  %v5297_v55 = vld [vmem:[#allocation4 + $0xa20] ss:$16 sps:$4 sm:$0xff]  }
  0xb4   :  { %2656 = vmatpush2.bf16.msra.mxu0 %v5222_v56  ;;  %v5302_v56 = vld [vmem:[#allocation4 + $0x804] ss:$16 sps:$4 sm:$0xff]  }
  0xb5   :  { %2697 = vmatpush2.bf16.msra.mxu1 %v5225_v57  ;;  %2657 = vmatprep.subr.bf16.mxu0 %v5230_v58  ;;  %v5305_v57 = vld [vmem:[#allocation4 + $0xa04] ss:$16 sps:$4 sm:$0xff]   ;;  %v5300_v58 = vld [vmem:[#allocation4 + $0x800] ss:$16 sps:$4 sm:$0xff]  }
  0xb6   :  { %2698 = vmatprep.subr.bf16.mxu1 %v5233_v59  ;;  %v5303_v59 = vld [vmem:[#allocation4 + $0xa00] ss:$16 sps:$4 sm:$0xff]  }
  0xb8   :  { %2658 = vmatpush2.bf16.msra.mxu0 %v5228_v60  ;;  %v5308_v60 = vld [vmem:[#allocation4 + $0x9e4] ss:$16 sps:$4 sm:$0xff]  }
  0xb9   :  { %2699 = vmatpush2.bf16.msra.mxu1 %v5231_v61  ;;  %2659 = vmatprep.subr.bf16.mxu0 %v5236_v62  ;;  %v5311_v61 = vld [vmem:[#allocation4 + $0xbe4] ss:$16 sps:$4 sm:$0xff]   ;;  %v5306_v62 = vld [vmem:[#allocation4 + $0x9e0] ss:$16 sps:$4 sm:$0xff]  }
  0xba   :  { %2700 = vmatprep.subr.bf16.mxu1 %v5239_v63  ;;  %v5309_v63 = vld [vmem:[#allocation4 + $0xbe0] ss:$16 sps:$4 sm:$0xff]  }
  0xbc   :  { %2660 = vmatpush2.bf16.msra.mxu0 %v5234_v0  ;;  %v5314_v0 = vld [vmem:[#allocation4 + $0x9c4] ss:$16 sps:$4 sm:$0xff]  }
  0xbd   :  { %2701 = vmatpush2.bf16.msra.mxu1 %v5237_v1  ;;  %2661 = vmatprep.subr.bf16.mxu0 %v5242_v2  ;;  %v5317_v1 = vld [vmem:[#allocation4 + $0xbc4] ss:$16 sps:$4 sm:$0xff]   ;;  %v5312_v2 = vld [vmem:[#allocation4 + $0x9c0] ss:$16 sps:$4 sm:$0xff]  }
  0xbe   :  { %2702 = vmatprep.subr.bf16.mxu1 %v5245_v3  ;;  %v5315_v3 = vld [vmem:[#allocation4 + $0xbc0] ss:$16 sps:$4 sm:$0xff]  }
  0xc0   :  { %2662 = vmatpush2.bf16.msra.mxu0 %v5240_v4  ;;  %v5320_v4 = vld [vmem:[#allocation4 + $0x9a4] ss:$16 sps:$4 sm:$0xff]  }
  0xc1   :  { %2703 = vmatpush2.bf16.msra.mxu1 %v5243_v5  ;;  %2663 = vmatprep.subr.bf16.mxu0 %v5248_v6  ;;  %v5323_v5 = vld [vmem:[#allocation4 + $0xba4] ss:$16 sps:$4 sm:$0xff]   ;;  %v5318_v6 = vld [vmem:[#allocation4 + $0x9a0] ss:$16 sps:$4 sm:$0xff]  }
  0xc2   :  { %2704 = vmatprep.subr.bf16.mxu1 %v5251_v7  ;;  %v5321_v7 = vld [vmem:[#allocation4 + $0xba0] ss:$16 sps:$4 sm:$0xff]  }
  0xc4   :  { %2664 = vmatpush2.bf16.msra.mxu0 %v5246_v10  ;;  %v5326_v10 = vld [vmem:[#allocation4 + $0x984] ss:$16 sps:$4 sm:$0xff]  }
  0xc5   :  { %2705 = vmatpush2.bf16.msra.mxu1 %v5249_v11  ;;  %2665 = vmatprep.subr.bf16.mxu0 %v5254_v12  ;;  %v5329_v11 = vld [vmem:[#allocation4 + $0xb84] ss:$16 sps:$4 sm:$0xff]   ;;  %v5324_v12 = vld [vmem:[#allocation4 + $0x980] ss:$16 sps:$4 sm:$0xff]  }
  0xc6   :  { %2706 = vmatprep.subr.bf16.mxu1 %v5257_v13  ;;  %v5327_v13 = vld [vmem:[#allocation4 + $0xb80] ss:$16 sps:$4 sm:$0xff]  }
  0xc8   :  { %2666 = vmatpush2.bf16.msra.mxu0 %v5252_v14  ;;  %v5332_v14 = vld [vmem:[#allocation4 + $0x964] ss:$16 sps:$4 sm:$0xff]  }
  0xc9   :  { %2707 = vmatpush2.bf16.msra.mxu1 %v5255_v15  ;;  %2717 = vmatprep.subr.bf16.mxu0 %v5260_v18  ;;  %v5335_v15 = vld [vmem:[#allocation4 + $0xb64] ss:$16 sps:$4 sm:$0xff]  }
  0xca   :  { %2758 = vmatprep.subr.bf16.mxu1 %v5263_v19  ;;  %v5338_v18 = vld [vmem:[#allocation4 + $0x944] ss:$16 sps:$4 sm:$0xff]  }
  0xcb   :  { %2668 = vmatmul.mubr.bf16.vlgmr.msra.gmra.mxu0 %v6104_v20  ;;  %v5341_v19 = vld [vmem:[#allocation4 + $0xb44] ss:$16 sps:$4 sm:$0xff]  }
  0xcc   :  { %2709 = vmatmul.mubr.bf16.vlgmr.msra.gmra.mxu1 %v6106_v21  ;;  %2718 = vmatpush1.bf16.msra.mxu0 %v5258_v22  ;;  %v5336_v22 = vld [vmem:[#allocation4 + $0x940] ss:$16 sps:$4 sm:$0xff]  }
  0xcd   :  { %2759 = vmatpush1.bf16.msra.mxu1 %v5261_v23  ;;  %2719 = vmatprep.subr.bf16.mxu0 %v5266_v24  ;;  %v5339_v23 = vld [vmem:[#allocation4 + $0xb40] ss:$16 sps:$4 sm:$0xff]   ;;  %v5344_v24 = vld [vmem:[#allocation4 + $0x924] ss:$16 sps:$4 sm:$0xff]  }
  0xce   :  { %2760 = vmatprep.subr.bf16.mxu1 %v5269_v25  ;;  %2749 = vmatprep.mubr.bf16.mxu0 %v6110_v29  ;;  %v5347_v25 = vld [vmem:[#allocation4 + $0xb24] ss:$16 sps:$4 sm:$0xff]  }
  0xcf   :  { %2790 = vmatprep.mubr.bf16.mxu1 %v6112_v32 }
  0xd0   :  { %2720 = vmatpush1.bf16.msra.mxu0 %v5264_v27  ;;  %v5345_v27 = vld [vmem:[#allocation4 + $0xb20] ss:$16 sps:$4 sm:$0xff]  }
  0xd1   :  { %2761 = vmatpush1.bf16.msra.mxu1 %v5267_v28  ;;  %2721 = vmatprep.subr.bf16.mxu0 %v5272_v31  ;;  %v5350_v28 = vld [vmem:[#allocation4 + $0x904] ss:$16 sps:$4 sm:$0xff]   ;;  %v5348_v31 = vld [vmem:[#allocation4 + $0x900] ss:$16 sps:$4 sm:$0xff]  }
  0xd2   :  { %2762 = vmatprep.subr.bf16.mxu1 %v5275_v33  ;;  %v5351_v33 = vld [vmem:[#allocation4 + $0xb00] ss:$16 sps:$4 sm:$0xff]  }
  0xd4   :  { %2722 = vmatpush1.bf16.msra.mxu0 %v5270_v34  ;;  %v109_v34 = vld [vmem:[#allocation2 + $0x40] sm:$0xff] }
  0xd5   :  { %2763 = vmatpush1.bf16.msra.mxu1 %v5273_v35  ;;  %2723 = vmatprep.subr.bf16.mxu0 %v5278_v36  ;;  %v111_v35 = vld [vmem:[#allocation2 + $0x50] sm:$0xff]  ;;  %v5356_v36 = vld [vmem:[#allocation4 + $0xc64] ss:$16 sps:$4 sm:$0xff]  }
  0xd6   :  { %2764 = vmatprep.subr.bf16.mxu1 %v5281_v38  ;;  %v5359_v38 = vld [vmem:[#allocation4 + $0xec] ss:$16 sps:$4 sm:$0xff]  }
  0xd8   :  { %2724 = vmatpush1.bf16.msra.mxu0 %v5276_v39  ;;  %v6116_v39 = vpack.c.bf16 %v109_v34, %v109_v34  ;;  %v5431_v34 = vld [vmem:[#allocation4 + $0x3ec] ss:$16 sps:$4 sm:$0xff]  }
  0xd9   :  { %2765 = vmatpush1.bf16.msra.mxu1 %v5279_v41  ;;  %2725 = vmatprep.subr.bf16.mxu0 %v5284_v42  ;;  %v6118_v41 = vpack.c.bf16 %v111_v35, %v111_v35  ;;  %v5354_v42 = vld [vmem:[#allocation4 + $0xc60] ss:$16 sps:$4 sm:$0xff]   ;;  %v5426_v35 = vld [vmem:[#allocation4 + $0x168] ss:$16 sps:$4 sm:$0xff]  }
  0xda   :  { %2766 = vmatprep.subr.bf16.mxu1 %v5287_v43  ;;  %v5357_v43 = vld [vmem:[#allocation4 + $0xe8] ss:$16 sps:$4 sm:$0xff]  }
  0xdc   :  { %2726 = vmatpush1.bf16.msra.mxu0 %v5282_v44  ;;  %v5362_v44 = vld [vmem:[#allocation4 + $0xc44] ss:$16 sps:$4 sm:$0xff]  }
  0xdd   :  { %2767 = vmatpush1.bf16.msra.mxu1 %v5285_v45  ;;  %2727 = vmatprep.subr.bf16.mxu0 %v5290_v46  ;;  %v5365_v45 = vld [vmem:[#allocation4 + $0xcc] ss:$16 sps:$4 sm:$0xff]   ;;  %v5360_v46 = vld [vmem:[#allocation4 + $0xc40] ss:$16 sps:$4 sm:$0xff]  }
  0xde   :  { %2768 = vmatprep.subr.bf16.mxu1 %v5293_v47  ;;  %v5363_v47 = vld [vmem:[#allocation4 + $0xc8] ss:$16 sps:$4 sm:$0xff]  }
  0xe0   :  { %2728 = vmatpush1.bf16.msra.mxu0 %v5288_v48  ;;  %v5368_v48 = vld [vmem:[#allocation4 + $0xc24] ss:$16 sps:$4 sm:$0xff]  }
  0xe1   :  { %2769 = vmatpush1.bf16.msra.mxu1 %v5291_v50  ;;  %2729 = vmatprep.subr.bf16.mxu0 %v5296_v51  ;;  %v5371_v50 = vld [vmem:[#allocation4 + $0xac] ss:$16 sps:$4 sm:$0xff]   ;;  %v6027_v51 = vmov 0  }
  0xe2   :  { %2770 = vmatprep.subr.bf16.mxu1 %v5299_v53  ;;  %v5366_v53 = vld [vmem:[#allocation4 + $0xc20] ss:$16 sps:$4 sm:$0xff]  }
  0xe4   :  { %2730 = vmatpush1.bf16.msra.mxu0 %v5294_v54  ;;  %v5369_v54 = vld [vmem:[#allocation4 + $0xa8] ss:$16 sps:$4 sm:$0xff]  }
  0xe5   :  { %2771 = vmatpush1.bf16.msra.mxu1 %v5297_v55  ;;  %2731 = vmatprep.subr.bf16.mxu0 %v5302_v56  ;;  %v5374_v55 = vld [vmem:[#allocation4 + $0xc04] ss:$16 sps:$4 sm:$0xff]   ;;  %v5377_v56 = vld [vmem:[#allocation4 + $0x8c] ss:$16 sps:$4 sm:$0xff]  }
  0xe6   :  { %2772 = vmatprep.subr.bf16.mxu1 %v5305_v57  ;;  %v5372_v57 = vld [vmem:[#allocation4 + $0xc00] ss:$16 sps:$4 sm:$0xff]  }
  0xe8   :  { %2732 = vmatpush1.bf16.msra.mxu0 %v5300_v58  ;;  %v5375_v58 = vld [vmem:[#allocation4 + $0x88] ss:$16 sps:$4 sm:$0xff]  }
  0xe9   :  { %2773 = vmatpush1.bf16.msra.mxu1 %v5303_v59  ;;  %2733 = vmatprep.subr.bf16.mxu0 %v5308_v60  ;;  %v113_v59 = vld [vmem:[#allocation2 + $0x60] sm:$0xff] }
  0xea   :  { %2774 = vmatprep.subr.bf16.mxu1 %v5311_v61  ;;  %v5380_v60 = vld [vmem:[#allocation4 + $0x6c] ss:$16 sps:$4 sm:$0xff]  }
  0xeb   :  { %v5383_v61 = vld [vmem:[#allocation4 + $0x2ec] ss:$16 sps:$4 sm:$0xff]  }
  0xec   :  { %2734 = vmatpush2.bf16.msra.mxu0 %v5306_v62  ;;  %v6124_v62 = vpack.c.bf16 %v113_v59, %v113_v59 }
  0xed   :  { %2775 = vmatpush2.bf16.msra.mxu1 %v5309_v63  ;;  %2735 = vmatprep.subr.bf16.mxu0 %v5314_v0  ;;  %v5381_v63 = vld [vmem:[#allocation4 + $0x2e8] ss:$16 sps:$4 sm:$0xff]   ;;  %v5386_v0 = vld [vmem:[#allocation4 + $0x4c] ss:$16 sps:$4 sm:$0xff]  }
  0xee   :  { %2776 = vmatprep.subr.bf16.mxu1 %v5317_v1  ;;  %v5389_v1 = vld [vmem:[#allocation4 + $0x2cc] ss:$16 sps:$4 sm:$0xff]  }
  0xf0   :  { %2736 = vmatpush2.bf16.msra.mxu0 %v5312_v2  ;;  %v5384_v2 = vld [vmem:[#allocation4 + $0x48] ss:$16 sps:$4 sm:$0xff]  }
  0xf1   :  { %2777 = vmatpush2.bf16.msra.mxu1 %v5315_v3  ;;  %2737 = vmatprep.subr.bf16.mxu0 %v5320_v4  ;;  %v5387_v3 = vld [vmem:[#allocation4 + $0x2c8] ss:$16 sps:$4 sm:$0xff]   ;;  %v5392_v4 = vld [vmem:[#allocation4 + $0x2c] ss:$16 sps:$4 sm:$0xff]  }
  0xf2   :  { %2778 = vmatprep.subr.bf16.mxu1 %v5323_v5  ;;  %v5395_v5 = vld [vmem:[#allocation4 + $0x2ac] ss:$16 sps:$4 sm:$0xff]  }
  0xf4   :  { %2738 = vmatpush2.bf16.msra.mxu0 %v5318_v6  ;;  %v5390_v6 = vld [vmem:[#allocation4 + $0x28] ss:$16 sps:$4 sm:$0xff]  }
  0xf5   :  { %2779 = vmatpush2.bf16.msra.mxu1 %v5321_v7  ;;  %2739 = vmatprep.subr.bf16.mxu0 %v5326_v10  ;;  %v5393_v7 = vld [vmem:[#allocation4 + $0x2a8] ss:$16 sps:$4 sm:$0xff]   ;;  %v5398_v10 = vld [vmem:[#allocation4 + $0xc] ss:$16 sps:$4 sm:$0xff]  }
  0xf6   :  { %2780 = vmatprep.subr.bf16.mxu1 %v5329_v11  ;;  %v5401_v11 = vld [vmem:[#allocation4 + $0x28c] ss:$16 sps:$4 sm:$0xff]  }
  0xf8   :  { %2740 = vmatpush2.bf16.msra.mxu0 %v5324_v12  ;;  %v5396_v12 = vld [vmem:[#allocation4 + $0x8] ss:$16 sps:$4 sm:$0xff]  }
  0xf9   :  { %2781 = vmatpush2.bf16.msra.mxu1 %v5327_v13  ;;  %2741 = vmatprep.subr.bf16.mxu0 %v5332_v14  ;;  %v5399_v13 = vld [vmem:[#allocation4 + $0x288] ss:$16 sps:$4 sm:$0xff]   ;;  %v5404_v14 = vld [vmem:[#allocation4 + $0x1ec] ss:$16 sps:$4 sm:$0xff]  }
  0xfa   :  { %2782 = vmatprep.subr.bf16.mxu1 %v5335_v15  ;;  %v5407_v15 = vld [vmem:[#allocation4 + $0x26c] ss:$16 sps:$4 sm:$0xff]  }
  0xfc   :  { %2742 = vmatpush2.bf16.msra.mxu0 %v5330_v16  ;;  %v5402_v16 = vld [vmem:[#allocation4 + $0x1e8] ss:$16 sps:$4 sm:$0xff]  }
  0xfd   :  { %2783 = vmatpush2.bf16.msra.mxu1 %v5333_v17  ;;  %2743 = vmatprep.subr.bf16.mxu0 %v5338_v18  ;;  %v5410_v17 = vld [vmem:[#allocation4 + $0x1cc] ss:$16 sps:$4 sm:$0xff]  }
  0xfe   :  { %2784 = vmatprep.subr.bf16.mxu1 %v5341_v19  ;;  %v5413_v18 = vld [vmem:[#allocation4 + $0x24c] ss:$16 sps:$4 sm:$0xff]   ;;  %v5408_v19 = vld [vmem:[#allocation4 + $0x1c8] ss:$16 sps:$4 sm:$0xff]  }
 0x100   :  { %2744 = vmatpush2.bf16.msra.mxu0 %v5336_v22  ;;  %v5411_v22 = vld [vmem:[#allocation4 + $0x248] ss:$16 sps:$4 sm:$0xff]  }
 0x101   :  { %2785 = vmatpush2.bf16.msra.mxu1 %v5339_v23  ;;  %2745 = vmatprep.subr.bf16.mxu0 %v5344_v24  ;;  %v5416_v23 = vld [vmem:[#allocation4 + $0x1ac] ss:$16 sps:$4 sm:$0xff]  }
 0x102   :  { %2786 = vmatprep.subr.bf16.mxu1 %v5347_v25  ;;  %v5419_v24 = vld [vmem:[#allocation4 + $0x22c] ss:$16 sps:$4 sm:$0xff]   ;;  %v5414_v25 = vld [vmem:[#allocation4 + $0x1a8] ss:$16 sps:$4 sm:$0xff]  }
 0x104   :  { %2746 = vmatpush2.bf16.msra.mxu0 %v5342_v26  ;;  %v5417_v26 = vld [vmem:[#allocation4 + $0x228] ss:$16 sps:$4 sm:$0xff]  }
 0x105   :  { %2787 = vmatpush2.bf16.msra.mxu1 %v5345_v27  ;;  %2747 = vmatprep.subr.bf16.mxu0 %v5350_v28  ;;  %v5422_v27 = vld [vmem:[#allocation4 + $0x18c] ss:$16 sps:$4 sm:$0xff]  }
 0x106   :  { %2788 = vmatprep.subr.bf16.mxu1 %v5353_v30  ;;  %v5425_v28 = vld [vmem:[#allocation4 + $0x20c] ss:$16 sps:$4 sm:$0xff]   ;;  %v5420_v30 = vld [vmem:[#allocation4 + $0x188] ss:$16 sps:$4 sm:$0xff]  }
 0x108   :  { %2748 = vmatpush2.bf16.msra.mxu0 %v5348_v31  ;;  %v5423_v31 = vld [vmem:[#allocation4 + $0x208] ss:$16 sps:$4 sm:$0xff]  }
 0x109   :  { %2789 = vmatpush2.bf16.msra.mxu1 %v5351_v33  ;;  %2807 = vmatprep.subr.bf16.mxu0 %v5356_v36  ;;  %v5428_v33 = vld [vmem:[#allocation4 + $0x16c] ss:$16 sps:$4 sm:$0xff]   ;;  %v5429_v36 = vld [vmem:[#allocation4 + $0x3e8] ss:$16 sps:$4 sm:$0xff]  }
 0x10a   :  { %2840 = vmatprep.subr.bf16.mxu1 %v5359_v38  ;;  %v5434_v38 = vld [vmem:[#allocation4 + $0x14c] ss:$16 sps:$4 sm:$0xff]  }
 0x10b   :  { %2750 = vmatmul.mubr.bf16.vlgmr.msra.gmra.mxu0 %v6116_v39 }
 0x10c   :  { %2791 = vmatmul.mubr.bf16.vlgmr.msra.gmra.mxu1 %v6118_v41  ;;  %2808 = vmatpush1.bf16.msra.mxu0 %v5354_v42  ;;  %v5437_v42 = vld [vmem:[#allocation4 + $0x3cc] ss:$16 sps:$4 sm:$0xff]  }
 0x10d   :  { %2841 = vmatpush1.bf16.msra.mxu1 %v5357_v43  ;;  %2809 = vmatprep.subr.bf16.mxu0 %v5362_v44  ;;  %v5432_v43 = vld [vmem:[#allocation4 + $0x148] ss:$16 sps:$4 sm:$0xff]  }
 0x10e   :  { %2842 = vmatprep.subr.bf16.mxu1 %v5365_v45  ;;  %2831 = vmatprep.mubr.bf16.mxu0 %v6027_v51  ;;  %v5435_v44 = vld [vmem:[#allocation4 + $0x3c8] ss:$16 sps:$4 sm:$0xff]   ;;  %v529_v45 = vlaneseq }
 0x10f   :  { %2872 = vmatprep.mubr.bf16.mxu1 %v6086_v49  ;;  %v5378_v49 = vld [vmem:[#allocation4 + $0x68] ss:$16 sps:$4 sm:$0xff]  }
 0x110   :  { %2810 = vmatpush1.bf16.msra.mxu0 %v5360_v46  ;;  %v5440_v46 = vld [vmem:[#allocation4 + $0x12c] ss:$16 sps:$4 sm:$0xff]  }
 0x111   :  { %2843 = vmatpush1.bf16.msra.mxu1 %v5363_v47  ;;  %2811 = vmatprep.subr.bf16.mxu0 %v5368_v48  ;;  %v5443_v47 = vld [vmem:[#allocation4 + $0x3ac] ss:$16 sps:$4 sm:$0xff]   ;;  %v5438_v48 = vld [vmem:[#allocation4 + $0x128] ss:$16 sps:$4 sm:$0xff]  }
 0x112   :  { %2844 = vmatprep.subr.bf16.mxu1 %v5371_v50  ;;  %v5441_v50 = vld [vmem:[#allocation4 + $0x3a8] ss:$16 sps:$4 sm:$0xff]  }
 0x114   :  { %2812 = vmatpush1.bf16.msra.mxu0 %v5366_v53  ;;  %v6129_v53 = vshrl.u32 %v529_v45, 7  ;;  %v5489_v45 = vld [vmem:[#allocation4 + $0x6a8] ss:$16 sps:$4 sm:$0xff]  }
 0x115   :  { %2845 = vmatpush1.bf16.msra.mxu1 %v5369_v54  ;;  %2813 = vmatprep.subr.bf16.mxu0 %v5374_v55  ;;  %v5446_v54 = vld [vmem:[#allocation4 + $0x10c] ss:$16 sps:$4 sm:$0xff]  }
 0x116   :  { %2846 = vmatprep.subr.bf16.mxu1 %v5377_v56  ;;  %v5449_v55 = vld [vmem:[#allocation4 + $0x38c] ss:$16 sps:$4 sm:$0xff]   ;;  %v5444_v56 = vld [vmem:[#allocation4 + $0x108] ss:$16 sps:$4 sm:$0xff]   ;;  %v531_v59 = vsub.s32 0, %v6129_v53 }
 0x118   :  { %2814 = vmatpush1.bf16.msra.mxu0 %v5372_v57  ;;  %v5447_v57 = vld [vmem:[#allocation4 + $0x388] ss:$16 sps:$4 sm:$0xff]  }
 0x119   :  { %2847 = vmatpush1.bf16.msra.mxu1 %v5375_v58  ;;  %2881 = vmatprep.subr.bf16.mxu0 %v5383_v61  ;;  %v527_v58 = vld [vmem:[#allocation6] sm:$0xf]  ;;  %v5455_v61 = vld [vmem:[#allocation4 + $0x4ec] ss:$16 sps:$4 sm:$0xff]  }
 0x11a   :  { %2848 = vmatprep.subr.bf16.mxu1 %v5380_v60  ;;  %v5452_v60 = vld [vmem:[#allocation4 + $0x36c] ss:$16 sps:$4 sm:$0xff]  }
 0x11b   :  { %4850 = vmatmul.mubr.msk.bf16.vlgmr.msra.gmra.mxu0 %vm2549_vm0, %v6124_v62 }
 0x11c   :  { %2882 = vmatpush1.bf16.msra.mxu0 %v5381_v63  ;;  %2913 = vmatprep.mubr.bf16.mxu0 %v6088_v52  ;;  %v5405_v52 = vld [vmem:[#allocation4 + $0x268] ss:$16 sps:$4 sm:$0xff]   ;;  %v532_v63 = vrot.slane %v527_v58, %v531_v59 }
 0x11d   :  { %2849 = vmatpush1.bf16.msra.mxu1 %v5378_v49  ;;  %2883 = vmatprep.subr.bf16.mxu0 %v5389_v1  ;;  %v535_v49 = vsub.s32 1, %v6129_v53  ;;  %v5453_v1 = vld [vmem:[#allocation4 + $0x4e8] ss:$16 sps:$4 sm:$0xff]  }
 0x11e   :  { %2850 = vmatprep.subr.bf16.mxu1 %v5386_v0  ;;  %v5450_v0 = vld [vmem:[#allocation4 + $0x368] ss:$16 sps:$4 sm:$0xff]  }
 0x120   :  { %2884 = vmatpush1.bf16.msra.mxu0 %v5387_v3  ;;  %v5461_v3 = vld [vmem:[#allocation4 + $0x4cc] ss:$16 sps:$4 sm:$0xff]  }
 0x121   :  { %2851 = vmatpush1.bf16.msra.mxu1 %v5384_v2  ;;  %2885 = vmatprep.subr.bf16.mxu0 %v5395_v5  ;;  %v5458_v2 = vld [vmem:[#allocation4 + $0x34c] ss:$16 sps:$4 sm:$0xff]  }
 0x122   :  { %2852 = vmatprep.subr.bf16.mxu1 %v5392_v4  ;;  %v536_v4 = vrot.slane %v527_v58, %v535_v49  ;;  %v5504_v58 = vld [vmem:[#allocation4 + $0x5c8] ss:$16 sps:$4 sm:$0xff]  }
 0x124   :  { %2886 = vmatpush1.bf16.msra.mxu0 %v5393_v7 }
 0x125   :  { %2853 = vmatpush1.bf16.msra.mxu1 %v5390_v6  ;;  %2887 = vmatprep.subr.bf16.mxu0 %v5401_v11  ;;  %v5459_v11 = vld [vmem:[#allocation4 + $0x4c8] ss:$16 sps:$4 sm:$0xff]  }
 0x126   :  { %2854 = vmatprep.subr.bf16.mxu1 %v5398_v10  ;;  %v5456_v10 = vld [vmem:[#allocation4 + $0x348] ss:$16 sps:$4 sm:$0xff]  }
 0x128   :  { %2888 = vmatpush1.bf16.msra.mxu0 %v5399_v13 }
 0x129   :  { %2855 = vmatpush1.bf16.msra.mxu1 %v5396_v12  ;;  %2889 = vmatprep.subr.bf16.mxu0 %v5407_v15  ;;  %v5467_v15 = vld [vmem:[#allocation4 + $0x4ac] ss:$16 sps:$4 sm:$0xff]  }
 0x12a   :  { %2856 = vmatprep.subr.bf16.mxu1 %v5404_v14  ;;  %v5464_v14 = vld [vmem:[#allocation4 + $0x32c] ss:$16 sps:$4 sm:$0xff]  }
 0x12c   :  { %2890 = vmatpush1.bf16.msra.mxu0 %v5405_v52 }
 0x12d   :  { %2857 = vmatpush2.bf16.msra.mxu1 %v5402_v16  ;;  %2891 = vmatprep.subr.bf16.mxu0 %v5413_v18 }
 0x12e   :  { %2858 = vmatprep.subr.bf16.mxu1 %v5410_v17 }
 0x130   :  { %2892 = vmatpush1.bf16.msra.mxu0 %v5411_v22  ;;  %v5465_v22 = vld [vmem:[#allocation4 + $0x4a8] ss:$16 sps:$4 sm:$0xff]  }
 0x131   :  { %2859 = vmatpush2.bf16.msra.mxu1 %v5408_v19  ;;  %2893 = vmatprep.subr.bf16.mxu0 %v5419_v24 }
 0x132   :  { %2860 = vmatprep.subr.bf16.mxu1 %v5416_v23 }
 0x134   :  { %2894 = vmatpush1.bf16.msra.mxu0 %v5417_v26  ;;  %v5473_v26 = vld [vmem:[#allocation4 + $0x48c] ss:$16 sps:$4 sm:$0xff]  }
 0x135   :  { %2861 = vmatpush2.bf16.msra.mxu1 %v5414_v25  ;;  %2895 = vmatprep.subr.bf16.mxu0 %v5425_v28  ;;  %v5470_v25 = vld [vmem:[#allocation4 + $0x30c] ss:$16 sps:$4 sm:$0xff]   ;;  %v5471_v28 = vld [vmem:[#allocation4 + $0x488] ss:$16 sps:$4 sm:$0xff]  }
 0x136   :  { %2862 = vmatprep.subr.bf16.mxu1 %v5422_v27  ;;  %v5468_v27 = vld [vmem:[#allocation4 + $0x308] ss:$16 sps:$4 sm:$0xff]  }
 0x138   :  { %2896 = vmatpush1.bf16.msra.mxu0 %v5423_v31  ;;  %v5474_v31 = vld [vmem:[#allocation4 + $0x468] ss:$16 sps:$4 sm:$0xff]  }
 0x139   :  { %2863 = vmatpush2.bf16.msra.mxu1 %v5420_v30  ;;  %2897 = vmatprep.subr.bf16.mxu0 %v5431_v34  ;;  %v5479_v30 = vld [vmem:[#allocation4 + $0x6ec] ss:$16 sps:$4 sm:$0xff]  }
 0x13a   :  { %2864 = vmatprep.subr.bf16.mxu1 %v5428_v33  ;;  %v5477_v33 = vld [vmem:[#allocation4 + $0x6e8] ss:$16 sps:$4 sm:$0xff]   ;;  %v5482_v34 = vld [vmem:[#allocation4 + $0x44c] ss:$16 sps:$4 sm:$0xff]  }
 0x13c   :  { %2898 = vmatpush2.bf16.msra.mxu0 %v5429_v36  ;;  %v5480_v36 = vld [vmem:[#allocation4 + $0x448] ss:$16 sps:$4 sm:$0xff]  }
 0x13d   :  { %2865 = vmatpush2.bf16.msra.mxu1 %v5426_v35  ;;  %2899 = vmatprep.subr.bf16.mxu0 %v5437_v42  ;;  %v5485_v35 = vld [vmem:[#allocation4 + $0x6cc] ss:$16 sps:$4 sm:$0xff]  }
 0x13e   :  { %2866 = vmatprep.subr.bf16.mxu1 %v5434_v38  ;;  %v5483_v38 = vld [vmem:[#allocation4 + $0x6c8] ss:$16 sps:$4 sm:$0xff]   ;;  %v5488_v42 = vld [vmem:[#allocation4 + $0x42c] ss:$16 sps:$4 sm:$0xff]  }
 0x140   :  { %2900 = vmatpush2.bf16.msra.mxu0 %v5435_v44  ;;  %v5486_v44 = vld [vmem:[#allocation4 + $0x428] ss:$16 sps:$4 sm:$0xff]  }
 0x141   :  { %2867 = vmatpush2.bf16.msra.mxu1 %v5432_v43  ;;  %2901 = vmatprep.subr.bf16.mxu0 %v5443_v47  ;;  %v5491_v43 = vld [vmem:[#allocation4 + $0x6ac] ss:$16 sps:$4 sm:$0xff]  }
 0x142   :  { %2868 = vmatprep.subr.bf16.mxu1 %v5440_v46  ;;  %v5494_v46 = vld [vmem:[#allocation4 + $0x40c] ss:$16 sps:$4 sm:$0xff]  }
 0x143   :  { %v5497_v47 = vld [vmem:[#allocation4 + $0x68c] ss:$16 sps:$4 sm:$0xff]  }
 0x144   :  { %2902 = vmatpush2.bf16.msra.mxu0 %v5441_v50  ;;  %v5495_v50 = vld [vmem:[#allocation4 + $0x688] ss:$16 sps:$4 sm:$0xff]  }
 0x145   :  { %2869 = vmatpush2.bf16.msra.mxu1 %v5438_v48  ;;  %2903 = vmatprep.subr.bf16.mxu0 %v5449_v55  ;;  %v5492_v48 = vld [vmem:[#allocation4 + $0x408] ss:$16 sps:$4 sm:$0xff]  }
 0x146   :  { %2870 = vmatprep.subr.bf16.mxu1 %v5446_v54  ;;  %v5503_v54 = vld [vmem:[#allocation4 + $0x66c] ss:$16 sps:$4 sm:$0xff]   ;;  %v5498_v55 = vld [vmem:[#allocation4 + $0x5e8] ss:$16 sps:$4 sm:$0xff]  }
 0x148   :  { %2904 = vmatpush2.bf16.msra.mxu0 %v5447_v57  ;;  %v5506_v57 = vld [vmem:[#allocation4 + $0x5cc] ss:$16 sps:$4 sm:$0xff]  }
 0x149   :  { %2871 = vmatpush2.bf16.msra.mxu1 %v5444_v56  ;;  %2905 = vmatprep.subr.bf16.mxu0 %v5452_v60  ;;  %v5501_v56 = vld [vmem:[#allocation4 + $0x668] ss:$16 sps:$4 sm:$0xff]  }
 0x14a   :  { %2922 = vmatprep.subr.bf16.mxu1 %v5455_v61  ;;  %v5507_v60 = vld [vmem:[#allocation4 + $0x648] ss:$16 sps:$4 sm:$0xff]   ;;  %v5512_v61 = vld [vmem:[#allocation4 + $0x5ac] ss:$16 sps:$4 sm:$0xff]  }
 0x14b   :  { %v2587_v5 = vpop.f32.mrf.mxu0 }
 0x14c   :  { %v2628_v6 = vpop.f32.mrf.mxu1  ;;  %2873 = vmatmul.mubr.bf16.vlgmr.msra.gmra.mxu1 %v6092_v8  ;;  %v2588_v7 = vadd.f32 %v2587_v5, %v532_v63  ;;  %2906 = vmatpush2.bf16.msra.mxu0 %v5450_v0  ;;  %v5462_v8 = vld [vmem:[#allocation4 + $0x328] ss:$16 sps:$4 sm:$0xff]   ;;  %v5515_v63 = vld [vmem:[#allocation4 + $0x62c] ss:$16 sps:$4 sm:$0xff]  }
 0x14d   :  { %2923 = vmatpush1.bf16.msra.mxu1 %v5453_v1  ;;  %v2589_v12 = vpop.f32.mrf.mxu0  ;;  %2907 = vmatprep.subr.bf16.mxu0 %v5458_v2  ;;  %v5510_v0 = vld [vmem:[#allocation4 + $0x5a8] ss:$16 sps:$4 sm:$0xff]   ;;  %v5518_v2 = vld [vmem:[#allocation4 + $0x58c] ss:$16 sps:$4 sm:$0xff]  }
 0x14e   :  { %v2630_v13 = vpop.f32.mrf.mxu1  ;;  %2924 = vmatprep.subr.bf16.mxu1 %v5461_v3  ;;  %v6138_v16 = vadd.f32 %v2628_v6, %v2588_v7  ;;  %v2590_v52 = vadd.f32 %v2589_v12, %v536_v4  ;;  %2954 = vmatprep.mubr.bf16.mxu1 %v6098_v37  ;;  %v5476_v37 = vld [vmem:[#allocation4 + $0x46c] ss:$16 sps:$4 sm:$0xff]   ;;  %v5513_v1 = vld [vmem:[#allocation4 + $0x628] ss:$16 sps:$4 sm:$0xff]  }
 0x14f   :  { %v2591_v17 = vpop.f32.mrf.mxu0  ;;  %v5521_v3 = vld [vmem:[#allocation4 + $0x60c] ss:$16 sps:$4 sm:$0xff]   ;;  %v5516_v4 = vld [vmem:[#allocation4 + $0x588] ss:$16 sps:$4 sm:$0xff]  }
 0x150   :  { %v2632_v18 = vpop.f32.mrf.mxu1  ;;  %v6141_v19 = vadd.f32 %v2630_v13, %v2590_v52  ;;  %2908 = vmatpush2.bf16.msra.mxu0 %v5456_v10  ;;  %v5519_v5 = vld [vmem:[#allocation4 + $0x608] ss:$16 sps:$4 sm:$0xff]   ;;  %v5524_v6 = vld [vmem:[#allocation4 + $0x56c] ss:$16 sps:$4 sm:$0xff]  }
 0x151   :  { %2925 = vmatpush1.bf16.msra.mxu1 %v5459_v11  ;;  %v2592_v23 = vpop.f32.mrf.mxu0  ;;  %2909 = vmatprep.subr.bf16.mxu0 %v5464_v14  ;;  %v5527_v7 = vld [vmem:[#allocation4 + $0x7ec] ss:$16 sps:$4 sm:$0xff]   ;;  %v5522_v10 = vld [vmem:[#allocation4 + $0x568] ss:$16 sps:$4 sm:$0xff]  }
 0x152   :  { %v2633_v24 = vpop.f32.mrf.mxu1  ;;  %2926 = vmatprep.subr.bf16.mxu1 %v5467_v15  ;;  %v5525_v11 = vld [vmem:[#allocation4 + $0x7e8] ss:$16 sps:$4 sm:$0xff]   ;;  %v5530_v12 = vld [vmem:[#allocation4 + $0x54c] ss:$16 sps:$4 sm:$0xff]  }
 0x153   :  { %v5533_v13 = vld [vmem:[#allocation4 + $0x7cc] ss:$16 sps:$4 sm:$0xff]   ;;  %v5528_v14 = vld [vmem:[#allocation4 + $0x548] ss:$16 sps:$4 sm:$0xff]  }
 0x154   :  { %2910 = vmatpush2.bf16.msra.mxu0 %v5462_v8  ;;  %v5531_v15 = vld [vmem:[#allocation4 + $0x7c8] ss:$16 sps:$4 sm:$0xff]   ;;  %v5536_v52 = vld [vmem:[#allocation4 + $0x52c] ss:$16 sps:$4 sm:$0xff]  }
 0x155   :  { %2927 = vmatpush1.bf16.msra.mxu1 %v5465_v22  ;;  %2911 = vmatprep.subr.bf16.mxu0 %v5470_v25  ;;  %v5539_v17 = vld [vmem:[#allocation4 + $0x7ac] ss:$16 sps:$4 sm:$0xff]   ;;  %v5534_v18 = vld [vmem:[#allocation4 + $0x528] ss:$16 sps:$4 sm:$0xff]  }
 0x156   :  { %2928 = vmatprep.subr.bf16.mxu1 %v5473_v26  ;;  %v5537_v8 = vld [vmem:[#allocation4 + $0x7a8] ss:$16 sps:$4 sm:$0xff]   ;;  %v5542_v22 = vld [vmem:[#allocation4 + $0x50c] ss:$16 sps:$4 sm:$0xff]  }
 0x157   :  { %v5545_v23 = vld [vmem:[#allocation4 + $0x78c] ss:$16 sps:$4 sm:$0xff]   ;;  %v5540_v24 = vld [vmem:[#allocation4 + $0x508] ss:$16 sps:$4 sm:$0xff]  }
 0x158   :  { %2912 = vmatpush2.bf16.msra.mxu0 %v5468_v27  ;;  %v5543_v25 = vld [vmem:[#allocation4 + $0x788] ss:$16 sps:$4 sm:$0xff]   ;;  %v5548_v26 = vld [vmem:[#allocation4 + $0x76c] ss:$16 sps:$4 sm:$0xff]  }
 0x159   :  { %2929 = vmatpush1.bf16.msra.mxu1 %v5471_v28  ;;  %2963 = vmatprep.subr.bf16.mxu0 %v5479_v30  ;;  %v5551_v27 = vld [vmem:[#allocation4 + $0x8ec] ss:$16 sps:$4 sm:$0xff]   ;;  %v5546_v28 = vld [vmem:[#allocation4 + $0x768] ss:$16 sps:$4 sm:$0xff]  }
 0x15a   :  { %2930 = vmatprep.subr.bf16.mxu1 %v5476_v37  ;;  %v5549_v37 = vld [vmem:[#allocation4 + $0x8e8] ss:$16 sps:$4 sm:$0xff]   ;;  %v5554_v30 = vld [vmem:[#allocation4 + $0x74c] ss:$16 sps:$4 sm:$0xff]  }
 0x15b   :  { %2914 = vmatmul.mubr.bf16.vlgmr.msra.gmra.mxu0 %v6094_v9  ;;  %v5500_v9 = vld [vmem:[#allocation4 + $0x5ec] ss:$16 sps:$4 sm:$0xff]  }
 0x15c   :  { %2964 = vmatpush1.bf16.msra.mxu0 %v5477_v33  ;;  %2995 = vmatprep.mubr.bf16.mxu0 %v6100_v40  ;;  %v5509_v40 = vld [vmem:[#allocation4 + $0x64c] ss:$16 sps:$4 sm:$0xff]   ;;  %v5552_v33 = vld [vmem:[#allocation4 + $0x748] ss:$16 sps:$4 sm:$0xff]  }
 0x15d   :  { %2931 = vmatpush1.bf16.msra.mxu1 %v5474_v31  ;;  %2965 = vmatprep.subr.bf16.mxu0 %v5485_v35  ;;  %v5557_v31 = vld [vmem:[#allocation4 + $0x8cc] ss:$16 sps:$4 sm:$0xff]  }
 0x15e   :  { %2932 = vmatprep.subr.bf16.mxu1 %v5482_v34  ;;  %v5555_v34 = vld [vmem:[#allocation4 + $0x8c8] ss:$16 sps:$4 sm:$0xff]  }
 0x160   :  { %2966 = vmatpush1.bf16.msra.mxu0 %v5483_v38  ;;  %v5560_v38 = vld [vmem:[#allocation4 + $0x72c] ss:$16 sps:$4 sm:$0xff]  }
 0x161   :  { %2933 = vmatpush1.bf16.msra.mxu1 %v5480_v36  ;;  %2967 = vmatprep.subr.bf16.mxu0 %v5491_v43 }
 0x162   :  { %2934 = vmatprep.subr.bf16.mxu1 %v5488_v42 }
 0x164   :  { %2968 = vmatpush1.bf16.msra.mxu0 %v5489_v45  ;;  %v5563_v45 = vld [vmem:[#allocation4 + $0x8ac] ss:$16 sps:$4 sm:$0xff]  }
 0x165   :  { %2935 = vmatpush1.bf16.msra.mxu1 %v5486_v44  ;;  %2969 = vmatprep.subr.bf16.mxu0 %v5497_v47 }
 0x166   :  { %2936 = vmatprep.subr.bf16.mxu1 %v5494_v46 }
 0x168   :  { %2970 = vmatpush1.bf16.msra.mxu0 %v5495_v50  ;;  %v5561_v50 = vld [vmem:[#allocation4 + $0x8a8] ss:$16 sps:$4 sm:$0xff]  }
 0x169   :  { %2937 = vmatpush1.bf16.msra.mxu1 %v5492_v48  ;;  %2971 = vmatprep.subr.bf16.mxu0 %v5503_v54  ;;  %v5558_v48 = vld [vmem:[#allocation4 + $0x728] ss:$16 sps:$4 sm:$0xff]  }
 0x16a   :  { %2938 = vmatprep.subr.bf16.mxu1 %v5500_v9 }
 0x16c   :  { %2972 = vmatpush1.bf16.msra.mxu0 %v5501_v56  ;;  %v5566_v56 = vld [vmem:[#allocation4 + $0x70c] ss:$16 sps:$4 sm:$0xff]  }
 0x16d   :  { %2939 = vmatpush2.bf16.msra.mxu1 %v5498_v55  ;;  %2973 = vmatprep.subr.bf16.mxu0 %v5509_v40  ;;  %v5564_v40 = vld [vmem:[#allocation4 + $0x708] ss:$16 sps:$4 sm:$0xff]  }
 0x16e   :  { %2940 = vmatprep.subr.bf16.mxu1 %v5506_v57  ;;  %v5569_v57 = vld [vmem:[#allocation4 + $0x88c] ss:$16 sps:$4 sm:$0xff]  }
 0x170   :  { %2974 = vmatpush1.bf16.msra.mxu0 %v5507_v60  ;;  %v5575_v60 = vld [vmem:[#allocation4 + $0xaec] ss:$16 sps:$4 sm:$0xff]  }
 0x171   :  { %2941 = vmatpush2.bf16.msra.mxu1 %v5504_v58  ;;  %2975 = vmatprep.subr.bf16.mxu0 %v5515_v63  ;;  %v5567_v58 = vld [vmem:[#allocation4 + $0x888] ss:$16 sps:$4 sm:$0xff]   ;;  %v5578_v63 = vld [vmem:[#allocation4 + $0x84c] ss:$16 sps:$4 sm:$0xff]  }
 0x172   :  { %2942 = vmatprep.subr.bf16.mxu1 %v5512_v61  ;;  %v5573_v61 = vld [vmem:[#allocation4 + $0xae8] ss:$16 sps:$4 sm:$0xff]  }
 0x174   :  { %2976 = vmatpush1.bf16.msra.mxu0 %v5513_v1  ;;  %v5576_v1 = vld [vmem:[#allocation4 + $0x848] ss:$16 sps:$4 sm:$0xff]  }
 0x175   :  { %2943 = vmatpush2.bf16.msra.mxu1 %v5510_v0  ;;  %2977 = vmatprep.subr.bf16.mxu0 %v5521_v3  ;;  %v5581_v0 = vld [vmem:[#allocation4 + $0xacc] ss:$16 sps:$4 sm:$0xff]  }
 0x176   :  { %2944 = vmatprep.subr.bf16.mxu1 %v5518_v2  ;;  %v5579_v2 = vld [vmem:[#allocation4 + $0xac8] ss:$16 sps:$4 sm:$0xff]   ;;  %v5584_v3 = vld [vmem:[#allocation4 + $0x82c] ss:$16 sps:$4 sm:$0xff]  }
 0x178   :  { %2978 = vmatpush1.bf16.msra.mxu0 %v5519_v5  ;;  %v5582_v5 = vld [vmem:[#allocation4 + $0x828] ss:$16 sps:$4 sm:$0xff]  }
 0x179   :  { %2945 = vmatpush2.bf16.msra.mxu1 %v5516_v4  ;;  %2979 = vmatprep.subr.bf16.mxu0 %v5527_v7  ;;  %v5587_v4 = vld [vmem:[#allocation4 + $0xaac] ss:$16 sps:$4 sm:$0xff]  }
 0x17a   :  { %2946 = vmatprep.subr.bf16.mxu1 %v5524_v6  ;;  %v5585_v6 = vld [vmem:[#allocation4 + $0xaa8] ss:$16 sps:$4 sm:$0xff]   ;;  %v5590_v7 = vld [vmem:[#allocation4 + $0x80c] ss:$16 sps:$4 sm:$0xff]  }
 0x17c   :  { %2980 = vmatpush2.bf16.msra.mxu0 %v5525_v11  ;;  %v5588_v11 = vld [vmem:[#allocation4 + $0x808] ss:$16 sps:$4 sm:$0xff]  }
 0x17d   :  { %2947 = vmatpush2.bf16.msra.mxu1 %v5522_v10  ;;  %2981 = vmatprep.subr.bf16.mxu0 %v5533_v13  ;;  %v5593_v10 = vld [vmem:[#allocation4 + $0xa8c] ss:$16 sps:$4 sm:$0xff]  }
 0x17e   :  { %2948 = vmatprep.subr.bf16.mxu1 %v5530_v12  ;;  %v5596_v12 = vld [vmem:[#allocation4 + $0x9ec] ss:$16 sps:$4 sm:$0xff]  }
 0x17f   :  { %v5599_v13 = vld [vmem:[#allocation4 + $0xa6c] ss:$16 sps:$4 sm:$0xff]  }
 0x180   :  { %2982 = vmatpush2.bf16.msra.mxu0 %v5531_v15  ;;  %v5597_v15 = vld [vmem:[#allocation4 + $0xa68] ss:$16 sps:$4 sm:$0xff]  }
 0x181   :  { %2949 = vmatpush2.bf16.msra.mxu1 %v5528_v14  ;;  %2983 = vmatprep.subr.bf16.mxu0 %v5539_v17  ;;  %v5594_v14 = vld [vmem:[#allocation4 + $0x9e8] ss:$16 sps:$4 sm:$0xff]  }
 0x182   :  { %2950 = vmatprep.subr.bf16.mxu1 %v5536_v52  ;;  %v5605_v52 = vld [vmem:[#allocation4 + $0xa4c] ss:$16 sps:$4 sm:$0xff]   ;;  %v5600_v17 = vld [vmem:[#allocation4 + $0x9c8] ss:$16 sps:$4 sm:$0xff]  }
 0x184   :  { %2984 = vmatpush2.bf16.msra.mxu0 %v5537_v8  ;;  %v5608_v8 = vld [vmem:[#allocation4 + $0x9ac] ss:$16 sps:$4 sm:$0xff]  }
 0x185   :  { %2951 = vmatpush2.bf16.msra.mxu1 %v5534_v18  ;;  %2985 = vmatprep.subr.bf16.mxu0 %v5545_v23  ;;  %v5603_v18 = vld [vmem:[#allocation4 + $0xa48] ss:$16 sps:$4 sm:$0xff]  }
 0x186   :  { %2952 = vmatprep.subr.bf16.mxu1 %v5542_v22  ;;  %v5611_v22 = vld [vmem:[#allocation4 + $0xa2c] ss:$16 sps:$4 sm:$0xff]   ;;  %v5606_v23 = vld [vmem:[#allocation4 + $0x9a8] ss:$16 sps:$4 sm:$0xff]  }
 0x188   :  { %2986 = vmatpush2.bf16.msra.mxu0 %v5543_v25  ;;  %v5614_v25 = vld [vmem:[#allocation4 + $0x98c] ss:$16 sps:$4 sm:$0xff]  }
 0x189   :  { %2953 = vmatpush2.bf16.msra.mxu1 %v5540_v24  ;;  %2987 = vmatprep.subr.bf16.mxu0 %v5548_v26  ;;  %v5609_v24 = vld [vmem:[#allocation4 + $0xa28] ss:$16 sps:$4 sm:$0xff]   ;;  %v5617_v26 = vld [vmem:[#allocation4 + $0xa0c] ss:$16 sps:$4 sm:$0xff]  }
 0x18a   :  { %3004 = vmatprep.subr.bf16.mxu1 %v5551_v27  ;;  %v5612_v27 = vld [vmem:[#allocation4 + $0x988] ss:$16 sps:$4 sm:$0xff]  }
 0x18b   :  { %v2669_v35 = vpop.f32.mrf.mxu0 }
 0x18c   :  { %v2710_v36 = vpop.f32.mrf.mxu1  ;;  %2955 = vmatmul.mubr.bf16.vlgmr.msra.gmra.mxu1 %v6104_v20  ;;  %v2670_v42 = vadd.f32 %v2669_v35, %v6138_v16  ;;  %2988 = vmatpush2.bf16.msra.mxu0 %v5546_v28  ;;  %v5615_v28 = vld [vmem:[#allocation4 + $0xa08] ss:$16 sps:$4 sm:$0xff]   ;;  %v5629_v35 = vld [vmem:[#allocation4 + $0xbcc] ss:$16 sps:$4 sm:$0xff]  }
 0x18d   :  { %3005 = vmatpush1.bf16.msra.mxu1 %v5549_v37  ;;  %v2671_v43 = vpop.f32.mrf.mxu0  ;;  %2989 = vmatprep.subr.bf16.mxu0 %v5554_v30  ;;  %v5620_v37 = vld [vmem:[#allocation4 + $0x96c] ss:$16 sps:$4 sm:$0xff]  }
 0x18e   :  { %v2712_v44 = vpop.f32.mrf.mxu1  ;;  %3006 = vmatprep.subr.bf16.mxu1 %v5557_v31  ;;  %v6147_v46 = vadd.f32 %v2710_v36, %v2670_v42  ;;  %v2672_v47 = vadd.f32 %v2671_v43, %v6141_v19  ;;  %3036 = vmatprep.mubr.bf16.mxu1 %v6110_v29  ;;  %v5572_v19 = vld [vmem:[#allocation4 + $0x86c] ss:$16 sps:$4 sm:$0xff]   ;;  %v5570_v29 = vld [vmem:[#allocation4 + $0x868] ss:$16 sps:$4 sm:$0xff]  }
 0x18f   :  { %v2673_v9 = vpop.f32.mrf.mxu0  ;;  %v5623_v30 = vld [vmem:[#allocation4 + $0xbec] ss:$16 sps:$4 sm:$0xff]   ;;  %v5618_v31 = vld [vmem:[#allocation4 + $0x968] ss:$16 sps:$4 sm:$0xff]  }
 0x190   :  { %v2714_v20 = vpop.f32.mrf.mxu1  ;;  %v6151_v54 = vadd.f32 %v2712_v44, %v2672_v47  ;;  %2990 = vmatpush2.bf16.msra.mxu0 %v5552_v33  ;;  %v5621_v33 = vld [vmem:[#allocation4 + $0xbe8] ss:$16 sps:$4 sm:$0xff]   ;;  %v5632_v42 = vld [vmem:[#allocation4 + $0x92c] ss:$16 sps:$4 sm:$0xff]  }
 0x191   :  { %3007 = vmatpush1.bf16.msra.mxu1 %v5555_v34  ;;  %v2674_v16 = vpop.f32.mrf.mxu0  ;;  %2991 = vmatprep.subr.bf16.mxu0 %v5560_v38  ;;  %v5626_v34 = vld [vmem:[#allocation4 + $0x94c] ss:$16 sps:$4 sm:$0xff]   ;;  %v5624_v36 = vld [vmem:[#allocation4 + $0x948] ss:$16 sps:$4 sm:$0xff]  }
 0x192   :  { %v2715_v55 = vpop.f32.mrf.mxu1  ;;  %3008 = vmatprep.subr.bf16.mxu1 %v5563_v45  ;;  %v5627_v38 = vld [vmem:[#allocation4 + $0xbc8] ss:$16 sps:$4 sm:$0xff]   ;;  %v5635_v43 = vld [vmem:[#allocation4 + $0xbac] ss:$16 sps:$4 sm:$0xff]  }
 0x193   :  { %v5630_v44 = vld [vmem:[#allocation4 + $0x928] ss:$16 sps:$4 sm:$0xff]   ;;  %v5638_v47 = vld [vmem:[#allocation4 + $0x90c] ss:$16 sps:$4 sm:$0xff]  }
 0x194   :  { %2992 = vmatpush2.bf16.msra.mxu0 %v5558_v48  ;;  %v5633_v45 = vld [vmem:[#allocation4 + $0xba8] ss:$16 sps:$4 sm:$0xff]   ;;  %v5641_v48 = vld [vmem:[#allocation4 + $0xb8c] ss:$16 sps:$4 sm:$0xff]  }
 0x195   :  { %3009 = vmatpush1.bf16.msra.mxu1 %v5561_v50  ;;  %2993 = vmatprep.subr.bf16.mxu0 %v5566_v56  ;;  %v5636_v50 = vld [vmem:[#allocation4 + $0x908] ss:$16 sps:$4 sm:$0xff]   ;;  %v5644_v20 = vld [vmem:[#allocation4 + $0xb6c] ss:$16 sps:$4 sm:$0xff]  }
 0x196   :  { %3010 = vmatprep.subr.bf16.mxu1 %v5569_v57  ;;  %v5639_v9 = vld [vmem:[#allocation4 + $0xb88] ss:$16 sps:$4 sm:$0xff]   ;;  %v5647_v16 = vld [vmem:[#allocation4 + $0xc6c] ss:$16 sps:$4 sm:$0xff]  }
 0x197   :  { %v5642_v55 = vld [vmem:[#allocation4 + $0xb68] ss:$16 sps:$4 sm:$0xff]   ;;  %v5650_v57 = vld [vmem:[#allocation4 + $0xb4c] ss:$16 sps:$4 sm:$0xff]  }
 0x198   :  { %2994 = vmatpush2.bf16.msra.mxu0 %v5564_v40  ;;  %v5645_v56 = vld [vmem:[#allocation4 + $0xc68] ss:$16 sps:$4 sm:$0xff]   ;;  %v5653_v40 = vld [vmem:[#allocation4 + $0xc4c] ss:$16 sps:$4 sm:$0xff]  }
 0x199   :  { %3011 = vmatpush1.bf16.msra.mxu1 %v5567_v58  ;;  %3045 = vmatprep.subr.bf16.mxu0 %v5575_v60 }
 0x19a   :  { %3012 = vmatprep.subr.bf16.mxu1 %v5572_v19 }
 0x19b   :  { %2996 = vmatmul.mubr.bf16.vlgmr.msra.gmra.mxu0 %v6106_v21  ;;  %v5591_v21 = vld [vmem:[#allocation4 + $0xa88] ss:$16 sps:$4 sm:$0xff]  }
 0x19c   :  { %3046 = vmatpush1.bf16.msra.mxu0 %v5573_v61  ;;  %3077 = vmatprep.mubr.bf16.mxu0 %v6112_v32  ;;  %v5602_v32 = vld [vmem:[#allocation4 + $0x9cc] ss:$16 sps:$4 sm:$0xff]   ;;  %v5651_v61 = vld [vmem:[#allocation4 + $0xc48] ss:$16 sps:$4 sm:$0xff]  }
 0x19d   :  { %3013 = vmatpush1.bf16.msra.mxu1 %v5570_v29  ;;  %3047 = vmatprep.subr.bf16.mxu0 %v5581_v0  ;;  %v5648_v29 = vld [vmem:[#allocation4 + $0xb48] ss:$16 sps:$4 sm:$0xff]  }
 0x19e   :  { %3014 = vmatprep.subr.bf16.mxu1 %v5578_v63 }
 0x1a0   :  { %3048 = vmatpush1.bf16.msra.mxu0 %v5579_v2  ;;  %v5659_v2 = vld [vmem:[#allocation4 + $0xc2c] ss:$16 sps:$4 sm:$0xff]  }
 0x1a1   :  { %3015 = vmatpush1.bf16.msra.mxu1 %v5576_v1  ;;  %3049 = vmatprep.subr.bf16.mxu0 %v5587_v4  ;;  %v5656_v1 = vld [vmem:[#allocation4 + $0xb2c] ss:$16 sps:$4 sm:$0xff]  }
 0x1a2   :  { %3016 = vmatprep.subr.bf16.mxu1 %v5584_v3 }
 0x1a4   :  { %3050 = vmatpush1.bf16.msra.mxu0 %v5585_v6 }
 0x1a5   :  { %3017 = vmatpush1.bf16.msra.mxu1 %v5582_v5  ;;  %3051 = vmatprep.subr.bf16.mxu0 %v5593_v10  ;;  %v5662_v10 = vld [vmem:[#allocation4 + $0xb0c] ss:$16 sps:$4 sm:$0xff]  }
 0x1a6   :  { %3018 = vmatprep.subr.bf16.mxu1 %v5590_v7 }
 0x1a8   :  { %3052 = vmatpush1.bf16.msra.mxu0 %v5591_v21  ;;  %v5660_v21 = vld [vmem:[#allocation4 + $0xb08] ss:$16 sps:$4 sm:$0xff]  }
 0x1a9   :  { %3019 = vmatpush1.bf16.msra.mxu1 %v5588_v11  ;;  %3053 = vmatprep.subr.bf16.mxu0 %v5599_v13  ;;  %v5665_v11 = vld [vmem:[#allocation4 + $0xc0c] ss:$16 sps:$4 sm:$0xff]   ;;  %v5668_v13 = vld [vmem:[#allocation7 + $0xe4] ss:$16 sps:$4 sm:$0xff]  }
 0x1aa   :  { %3020 = vmatprep.subr.bf16.mxu1 %v5596_v12  ;;  %v5663_v12 = vld [vmem:[#allocation4 + $0xc08] ss:$16 sps:$4 sm:$0xff]  }
 0x1ac   :  { %3054 = vmatpush1.bf16.msra.mxu0 %v5597_v15  ;;  %v5671_v15 = vld [vmem:[#allocation7 + $0xc4] ss:$16 sps:$4 sm:$0xff]  }
 0x1ad   :  { %3021 = vmatpush2.bf16.msra.mxu1 %v5594_v14  ;;  %3055 = vmatprep.subr.bf16.mxu0 %v5605_v52  ;;  %v5666_v14 = vld [vmem:[#allocation7 + $0xe0] ss:$16 sps:$4 sm:$0xff]  }
 0x1ae   :  { %3022 = vmatprep.subr.bf16.mxu1 %v5602_v32 }
 0x1b0   :  { %3056 = vmatpush1.bf16.msra.mxu0 %v5603_v18 }
 0x1b1   :  { %3023 = vmatpush2.bf16.msra.mxu1 %v5600_v17  ;;  %3057 = vmatprep.subr.bf16.mxu0 %v5611_v22  ;;  %v5669_v17 = vld [vmem:[#allocation7 + $0xc0] ss:$16 sps:$4 sm:$0xff]  }
 0x1b2   :  { %3024 = vmatprep.subr.bf16.mxu1 %v5608_v8  ;;  %v5674_v8 = vld [vmem:[#allocation7 + $0xa4] ss:$16 sps:$4 sm:$0xff]  }
 0x1b4   :  { %3058 = vmatpush1.bf16.msra.mxu0 %v5609_v24  ;;  %v5672_v24 = vld [vmem:[#allocation7 + $0xa0] ss:$16 sps:$4 sm:$0xff]  }
 0x1b5   :  { %3025 = vmatpush2.bf16.msra.mxu1 %v5606_v23  ;;  %3059 = vmatprep.subr.bf16.mxu0 %v5617_v26  ;;  %v5677_v26 = vld [vmem:[#allocation7 + $0x84] ss:$16 sps:$4 sm:$0xff]  }
 0x1b6   :  { %3026 = vmatprep.subr.bf16.mxu1 %v5614_v25 }
 0x1b8   :  { %3060 = vmatpush1.bf16.msra.mxu0 %v5615_v28  ;;  %v5764_v28 = vld [vmem:[#allocation7 + $0x2e4] ss:$16 sps:$4 sm:$0xff]  }
 0x1b9   :  { %3027 = vmatpush2.bf16.msra.mxu1 %v5612_v27  ;;  %3061 = vmatprep.subr.bf16.mxu0 %v5623_v30  ;;  %v5762_v27 = vld [vmem:[#allocation7 + $0x2e0] ss:$16 sps:$4 sm:$0xff]   ;;  %v5680_v30 = vld [vmem:[#allocation7 + $0x64] ss:$16 sps:$4 sm:$0xff]  }
 0x1ba   :  { %3028 = vmatprep.subr.bf16.mxu1 %v5620_v37  ;;  %v5767_v37 = vld [vmem:[#allocation7 + $0x2c4] ss:$16 sps:$4 sm:$0xff]  }
 0x1bc   :  { %3062 = vmatpush2.bf16.msra.mxu0 %v5621_v33  ;;  %v5770_v33 = vld [vmem:[#allocation7 + $0x2a4] ss:$16 sps:$4 sm:$0xff]  }
 0x1bd   :  { %3029 = vmatpush2.bf16.msra.mxu1 %v5618_v31  ;;  %3063 = vmatprep.subr.bf16.mxu0 %v5629_v35  ;;  %v5765_v31 = vld [vmem:[#allocation7 + $0x2c0] ss:$16 sps:$4 sm:$0xff]   ;;  %v5683_v35 = vld [vmem:[#allocation7 + $0x44] ss:$16 sps:$4 sm:$0xff]  }
 0x1be   :  { %3030 = vmatprep.subr.bf16.mxu1 %v5626_v34  ;;  %v5678_v34 = vld [vmem:[#allocation7 + $0x60] ss:$16 sps:$4 sm:$0xff]  }
 0x1c0   :  { %3064 = vmatpush2.bf16.msra.mxu0 %v5627_v38  ;;  %v5773_v38 = vld [vmem:[#allocation7 + $0x284] ss:$16 sps:$4 sm:$0xff]  }
 0x1c1   :  { %3031 = vmatpush2.bf16.msra.mxu1 %v5624_v36  ;;  %3065 = vmatprep.subr.bf16.mxu0 %v5635_v43  ;;  %v5768_v36 = vld [vmem:[#allocation7 + $0x2a0] ss:$16 sps:$4 sm:$0xff]   ;;  %v5686_v43 = vld [vmem:[#allocation7 + $0x24] ss:$16 sps:$4 sm:$0xff]  }
 0x1c2   :  { %3032 = vmatprep.subr.bf16.mxu1 %v5632_v42  ;;  %v5681_v42 = vld [vmem:[#allocation7 + $0x40] ss:$16 sps:$4 sm:$0xff]  }
 0x1c4   :  { %3066 = vmatpush2.bf16.msra.mxu0 %v5633_v45  ;;  %v5776_v45 = vld [vmem:[#allocation7 + $0x264] ss:$16 sps:$4 sm:$0xff]  }
 0x1c5   :  { %3033 = vmatpush2.bf16.msra.mxu1 %v5630_v44  ;;  %3067 = vmatprep.subr.bf16.mxu0 %v5641_v48  ;;  %v5771_v44 = vld [vmem:[#allocation7 + $0x280] ss:$16 sps:$4 sm:$0xff]   ;;  %v5689_v48 = vld [vmem:[#allocation7 + $0x4] ss:$16 sps:$4 sm:$0xff]  }
 0x1c6   :  { %3034 = vmatprep.subr.bf16.mxu1 %v5638_v47  ;;  %v5684_v47 = vld [vmem:[#allocation7 + $0x20] ss:$16 sps:$4 sm:$0xff]  }
 0x1c8   :  { %3068 = vmatpush2.bf16.msra.mxu0 %v5639_v9  ;;  %v5779_v9 = vld [vmem:[#allocation7 + $0x244] ss:$16 sps:$4 sm:$0xff]  }
 0x1c9   :  { %3035 = vmatpush2.bf16.msra.mxu1 %v5636_v50  ;;  %3069 = vmatprep.subr.bf16.mxu0 %v5644_v20  ;;  %v5774_v50 = vld [vmem:[#allocation7 + $0x260] ss:$16 sps:$4 sm:$0xff]  }
 0x1ca   :  { %3094 = vmatprep.subr.bf16.mxu1 %v5647_v16  ;;  %v5687_v20 = vld [vmem:[#allocation7] ss:$16 sps:$4 sm:$0xff]   ;;  %v5692_v16 = vld [vmem:[#allocation7 + $0x1e4] ss:$16 sps:$4 sm:$0xff]  }
 0x1cb   :  { %v2751_v58 = vpop.f32.mrf.mxu0 }
 0x1cc   :  { %v2792_v19 = vpop.f32.mrf.mxu1  ;;  %3037 = vmatmul.mubr.bf16.vlgmr.msra.gmra.mxu1 %v6116_v39  ;;  %v2752_v60 = vadd.f32 %v2751_v58, %v6147_v46  ;;  %3070 = vmatpush2.bf16.msra.mxu0 %v5642_v55  ;;  %v5654_v39 = vld [vmem:[#allocation4 + $0xb28] ss:$16 sps:$4 sm:$0xff]   ;;  %v5777_v55 = vld [vmem:[#allocation7 + $0x240] ss:$16 sps:$4 sm:$0xff]  }
 0x1cd   :  { %3095 = vmatpush1.bf16.msra.mxu1 %v5645_v56  ;;  %v2753_v63 = vpop.f32.mrf.mxu0  ;;  %3071 = vmatprep.subr.bf16.mxu0 %v5650_v57  ;;  %v5657_v46 = vld [vmem:[#allocation4 + $0xc28] ss:$16 sps:$4 sm:$0xff]   ;;  %v5690_v57 = vld [vmem:[#allocation7 + $0x1e0] ss:$16 sps:$4 sm:$0xff]  }
 0x1ce   :  { %v2794_v0 = vpop.f32.mrf.mxu1  ;;  %3096 = vmatprep.subr.bf16.mxu1 %v5653_v40  ;;  %v6157_v3 = vadd.f32 %v2792_v19, %v2752_v60  ;;  %3118 = vmatprep.mubr.bf16.mxu1 %v6027_v51  ;;  %v2754_v51 = vadd.f32 %v2753_v63, %v6151_v54  ;;  %v5782_v56 = vld [vmem:[#allocation7 + $0x224] ss:$16 sps:$4 sm:$0xff]   ;;  %v5780_v58 = vld [vmem:[#allocation7 + $0x220] ss:$16 sps:$4 sm:$0xff]  }
 0x1cf   :  { %v2755_v4 = vpop.f32.mrf.mxu0  ;;  %v5695_v40 = vld [vmem:[#allocation7 + $0x1c4] ss:$16 sps:$4 sm:$0xff]   ;;  %v5693_v60 = vld [vmem:[#allocation7 + $0x1c0] ss:$16 sps:$4 sm:$0xff]  }
 0x1d0   :  { %v2796_v5 = vpop.f32.mrf.mxu1  ;;  %3072 = vmatpush2.bf16.msra.mxu0 %v5648_v29  ;;  %v2795_v52 = vadd.f32 %v2794_v0, %v2754_v51  ;;  %v5785_v19 = vld [vmem:[#allocation7 + $0x204] ss:$16 sps:$4 sm:$0xff]   ;;  %v5696_v0 = vld [vmem:[#allocation7 + $0x1a0] ss:$16 sps:$4 sm:$0xff]  }
 0x1d1   :  { %3097 = vmatpush1.bf16.msra.mxu1 %v5651_v61  ;;  %v2756_v6 = vpop.f32.mrf.mxu0  ;;  %3073 = vmatprep.subr.bf16.mxu0 %v5656_v1  ;;  %v5698_v29 = vld [vmem:[#allocation7 + $0x1a4] ss:$16 sps:$4 sm:$0xff]   ;;  %v5783_v61 = vld [vmem:[#allocation7 + $0x200] ss:$16 sps:$4 sm:$0xff]  }
 0x1d2   :  { %v2797_v7 = vpop.f32.mrf.mxu1  ;;  %3098 = vmatprep.subr.bf16.mxu1 %v5659_v2  ;;  %v5788_v63 = vld [vmem:[#allocation7 + $0x3e4] ss:$16 sps:$4 sm:$0xff]   ;;  %v5786_v2 = vld [vmem:[#allocation7 + $0x3e0] ss:$16 sps:$4 sm:$0xff]  }
 0x1d3   :  { %v5701_v1 = vld [vmem:[#allocation7 + $0x184] ss:$16 sps:$4 sm:$0xff]   ;;  %v5699_v5 = vld [vmem:[#allocation7 + $0x180] ss:$16 sps:$4 sm:$0xff]  }
 0x1d4   :  { %3074 = vmatpush2.bf16.msra.mxu0 %v5654_v39  ;;  %v5791_v4 = vld [vmem:[#allocation7 + $0x3c4] ss:$16 sps:$4 sm:$0xff]   ;;  %v5702_v6 = vld [vmem:[#allocation7 + $0x160] ss:$16 sps:$4 sm:$0xff]  }
 0x1d5   :  { %3099 = vmatpush1.bf16.msra.mxu1 %v5657_v46  ;;  %3075 = vmatprep.subr.bf16.mxu0 %v5662_v10  ;;  %v5704_v39 = vld [vmem:[#allocation7 + $0x164] ss:$16 sps:$4 sm:$0xff]   ;;  %v5789_v46 = vld [vmem:[#allocation7 + $0x3c0] ss:$16 sps:$4 sm:$0xff]  }
 0x1d6   :  { %3100 = vmatprep.subr.bf16.mxu1 %v5665_v11  ;;  %v5707_v7 = vld [vmem:[#allocation7 + $0x144] ss:$16 sps:$4 sm:$0xff]   ;;  %v5705_v11 = vld [vmem:[#allocation7 + $0x140] ss:$16 sps:$4 sm:$0xff]  }
 0x1d7   :  { %v5792_v51 = vld [vmem:[#allocation7 + $0x3a0] ss:$16 sps:$4 sm:$0xff]  }
 0x1d8   :  { %3076 = vmatpush2.bf16.msra.mxu0 %v5660_v21  ;;  %v5794_v21 = vld [vmem:[#allocation7 + $0x3a4] ss:$16 sps:$4 sm:$0xff]  }
 0x1d9   :  { %3101 = vmatpush1.bf16.msra.mxu1 %v5663_v12  ;;  %3925 = vmatprep.subr.bf16.mxu0 %v5668_v13  ;;  %v5710_v13 = vld [vmem:[#allocation7 + $0x124] ss:$16 sps:$4 sm:$0xff]  }
 0x1da   :  { %3966 = vmatprep.subr.bf16.mxu1 %v5764_v28 }
 0x1db   :  { %v6161_v32 = vpop.f32.mrf.mxu0  ;;  %3078 = vmatmul.mubr.bf16.vlgmr.msra.gmra.mxu0 %v6118_v41 }
 0x1dc   :  { %4851 = vmatmul.mubr.msk.bf16.vlgmr.msra.gmra.mxu1 %vm2549_vm0, %v6124_v62  ;;  %3926 = vmatpush1.bf16.msra.mxu0 %v5666_v14  ;;  %v5675_v62 = vld [vmem:[#allocation7 + $0x80] ss:$16 sps:$4 sm:$0xff]  }
 0x1dd   :  { %v2835_v18 = vpop.f32.mrf.mxu0  ;;  %3927 = vmatprep.subr.bf16.mxu0 %v5671_v15  ;;  %3967 = vmatpush1.bf16.msra.mxu1 %v5762_v27  ;;  %v5708_v15 = vld [vmem:[#allocation7 + $0x120] ss:$16 sps:$4 sm:$0xff]   ;;  %v5803_v27 = vld [vmem:[#allocation7 + $0x344] ss:$16 sps:$4 sm:$0xff]  }
 0x1de   :  { %v2836_v22 = vadd.f32 %v2835_v18, %v2795_v52  ;;  %3968 = vmatprep.subr.bf16.mxu1 %v5767_v37  ;;  %v5797_v52 = vld [vmem:[#allocation7 + $0x384] ss:$16 sps:$4 sm:$0xff]   ;;  %v5716_v37 = vld [vmem:[#allocation7 + $0xec] ss:$16 sps:$4 sm:$0xff]  }
 0x1df   :  { %v2837_v54 = vpop.f32.mrf.mxu0 }
 0x1e0   :  { %v3128_v23 = vmax.f32 %v2836_v22, 0.0  ;;  %3928 = vmatpush1.bf16.msra.mxu0 %v5669_v17  ;;  %v2834_v17 = vadd.f32 %v6161_v32, %v6157_v3  ;;  %v5795_v22 = vld [vmem:[#allocation7 + $0x380] ss:$16 sps:$4 sm:$0xff]   ;;  %v5800_v54 = vld [vmem:[#allocation7 + $0x364] ss:$16 sps:$4 sm:$0xff]  }
 0x1e1   :  { %v2838_v25 = vpop.f32.mrf.mxu0  ;;  %3929 = vmatprep.subr.bf16.mxu0 %v5674_v8  ;;  %3969 = vmatpush1.bf16.msra.mxu1 %v5765_v31  ;;  %v5713_v8 = vld [vmem:[#allocation7 + $0x104] ss:$16 sps:$4 sm:$0xff]   ;;  %v5890_v3 = vld [vmem:[#allocation6] sm:$0xf]  ;;  %v5714_v31 = vld [vmem:[#allocation7 + $0xe8] ss:$16 sps:$4 sm:$0xff]  }
 0x1e2   :  { %v6166_v41 = vpack.c.bf16 %v3128_v23, %v3128_v23  ;;  %3970 = vmatprep.subr.bf16.mxu1 %v5770_v33  ;;  %v539_v23 = vsub.s32 2, %v6129_v53  ;;  %v543_v25 = vsub.s32 3, %v6129_v53  ;;  %v3127_v28 = vmax.f32 %v2834_v17, 0.0 }
 0x1e4   :  { %3930 = vmatpush1.bf16.msra.mxu0 %v5672_v24  ;;  %3957 = vmatprep.mubr.bf16.mxu0 %v6166_v41  ;;  %v5798_v24 = vld [vmem:[#allocation7 + $0x360] ss:$16 sps:$4 sm:$0xff]   ;;  %v540_v32 = vrot.slane %v5890_v3, %v539_v23  ;;  %v6177_v33 = vpack.c.bf16 %v3127_v28, %v3127_v28 }
 0x1e5   :  { %3931 = vmatprep.subr.bf16.mxu0 %v5677_v26  ;;  %3971 = vmatpush1.bf16.msra.mxu1 %v5768_v36  ;;  %v5711_v26 = vld [vmem:[#allocation7 + $0x100] ss:$16 sps:$4 sm:$0xff]  }
 0x1e6   :  { %3972 = vmatprep.subr.bf16.mxu1 %v5773_v38 }
 0x1e8   :  { %3932 = vmatpush1.bf16.msra.mxu0 %v5675_v62  ;;  %v5801_v62 = vld [vmem:[#allocation7 + $0x340] ss:$16 sps:$4 sm:$0xff]  }
 0x1e9   :  { %3933 = vmatprep.subr.bf16.mxu0 %v5680_v30  ;;  %3973 = vmatpush1.bf16.msra.mxu1 %v5771_v44  ;;  %v544_v30 = vrot.slane %v5890_v3, %v543_v25  ;;  %v5806_v44 = vld [vmem:[#allocation7 + $0x324] ss:$16 sps:$4 sm:$0xff]  }
 0x1ea   :  { %3974 = vmatprep.subr.bf16.mxu1 %v5776_v45 }
 0x1ec   :  { %3934 = vmatpush1.bf16.msra.mxu0 %v5678_v34  ;;  %v5719_v34 = vld [vmem:[#allocation7 + $0xcc] ss:$16 sps:$4 sm:$0xff]  }
 0x1ed   :  { %3935 = vmatprep.subr.bf16.mxu0 %v5683_v35  ;;  %3975 = vmatpush1.bf16.msra.mxu1 %v5774_v50 }
 0x1ee   :  { %3976 = vmatprep.subr.bf16.mxu1 %v5779_v9 }
 0x1f0   :  { %3936 = vmatpush1.bf16.msra.mxu0 %v5681_v42 }
 0x1f1   :  { %3937 = vmatprep.subr.bf16.mxu0 %v5686_v43  ;;  %3977 = vmatpush1.bf16.msra.mxu1 %v5777_v55  ;;  %v5717_v43 = vld [vmem:[#allocation7 + $0xc8] ss:$16 sps:$4 sm:$0xff]  }
 0x1f2   :  { %3978 = vmatprep.subr.bf16.mxu1 %v5782_v56  ;;  %v5725_v56 = vld [vmem:[#allocation7 + $0x8c] ss:$16 sps:$4 sm:$0xff]  }
 0x1f4   :  { %3938 = vmatpush1.bf16.msra.mxu0 %v5684_v47  ;;  %v5722_v47 = vld [vmem:[#allocation7 + $0xac] ss:$16 sps:$4 sm:$0xff]  }
 0x1f5   :  { %3939 = vmatprep.subr.bf16.mxu0 %v5689_v48  ;;  %3979 = vmatpush1.bf16.msra.mxu1 %v5780_v58  ;;  %v5804_v48 = vld [vmem:[#allocation7 + $0x320] ss:$16 sps:$4 sm:$0xff]   ;;  %v5728_v58 = vld [vmem:[#allocation7 + $0x6c] ss:$16 sps:$4 sm:$0xff]  }
 0x1f6   :  { %3980 = vmatprep.subr.bf16.mxu1 %v5785_v19  ;;  %v5726_v19 = vld [vmem:[#allocation7 + $0x68] ss:$16 sps:$4 sm:$0xff]  }
 0x1f8   :  { %3940 = vmatpush1.bf16.msra.mxu0 %v5687_v20  ;;  %v5720_v20 = vld [vmem:[#allocation7 + $0xa8] ss:$16 sps:$4 sm:$0xff]  }
 0x1f9   :  { %3941 = vmatprep.subr.bf16.mxu0 %v5692_v16  ;;  %3981 = vmatpush1.bf16.msra.mxu1 %v5783_v61  ;;  %v5809_v16 = vld [vmem:[#allocation7 + $0x304] ss:$16 sps:$4 sm:$0xff]   ;;  %v5734_v61 = vld [vmem:[#allocation7 + $0x2c] ss:$16 sps:$4 sm:$0xff]  }
 0x1fa   :  { %3982 = vmatprep.subr.bf16.mxu1 %v5788_v63  ;;  %v5732_v63 = vld [vmem:[#allocation7 + $0x28] ss:$16 sps:$4 sm:$0xff]  }
 0x1fc   :  { %3942 = vmatpush2.bf16.msra.mxu0 %v5690_v57  ;;  %v5807_v57 = vld [vmem:[#allocation7 + $0x300] ss:$16 sps:$4 sm:$0xff]  }
 0x1fd   :  { %3943 = vmatprep.subr.bf16.mxu0 %v5695_v40  ;;  %3983 = vmatpush2.bf16.msra.mxu1 %v5786_v2  ;;  %v5812_v40 = vld [vmem:[#allocation7 + $0x2ec] ss:$16 sps:$4 sm:$0xff]  }
 0x1fe   :  { %3984 = vmatprep.subr.bf16.mxu1 %v5791_v4  ;;  %v5740_v2 = vld [vmem:[#allocation7 + $0x1ec] ss:$16 sps:$4 sm:$0xff]   ;;  %v5738_v4 = vld [vmem:[#allocation7 + $0x1e8] ss:$16 sps:$4 sm:$0xff]  }
 0x200   :  { %3944 = vmatpush2.bf16.msra.mxu0 %v5693_v60  ;;  %v5731_v60 = vld [vmem:[#allocation7 + $0x4c] ss:$16 sps:$4 sm:$0xff]  }
 0x201   :  { %3945 = vmatprep.subr.bf16.mxu0 %v5698_v29  ;;  %3985 = vmatpush2.bf16.msra.mxu1 %v5789_v46  ;;  %v5729_v29 = vld [vmem:[#allocation7 + $0x48] ss:$16 sps:$4 sm:$0xff]   ;;  %v5746_v46 = vld [vmem:[#allocation7 + $0x1ac] ss:$16 sps:$4 sm:$0xff]  }
 0x202   :  { %3986 = vmatprep.subr.bf16.mxu1 %v5794_v21  ;;  %v5750_v21 = vld [vmem:[#allocation7 + $0x168] ss:$16 sps:$4 sm:$0xff]  }
 0x204   :  { %3946 = vmatpush2.bf16.msra.mxu0 %v5696_v0  ;;  %v5737_v0 = vld [vmem:[#allocation7 + $0xc] ss:$16 sps:$4 sm:$0xff]  }
 0x205   :  { %3947 = vmatprep.subr.bf16.mxu0 %v5701_v1  ;;  %3987 = vmatpush2.bf16.msra.mxu1 %v5792_v51  ;;  %v5735_v1 = vld [vmem:[#allocation7 + $0x8] ss:$16 sps:$4 sm:$0xff]  }
 0x206   :  { %3988 = vmatprep.subr.bf16.mxu1 %v5797_v52  ;;  %v5758_v52 = vld [vmem:[#allocation7 + $0x12c] ss:$16 sps:$4 sm:$0xff]  }
 0x208   :  { %3948 = vmatpush2.bf16.msra.mxu0 %v5699_v5  ;;  %v5743_v5 = vld [vmem:[#allocation7 + $0x1cc] ss:$16 sps:$4 sm:$0xff]  }
 0x209   :  { %3949 = vmatprep.subr.bf16.mxu0 %v5704_v39  ;;  %3989 = vmatpush2.bf16.msra.mxu1 %v5795_v22  ;;  %v5741_v39 = vld [vmem:[#allocation7 + $0x1c8] ss:$16 sps:$4 sm:$0xff]  }
 0x20a   :  { %3990 = vmatprep.subr.bf16.mxu1 %v5800_v54  ;;  %v5761_v54 = vld [vmem:[#allocation7 + $0x10c] ss:$16 sps:$4 sm:$0xff]  }
 0x20c   :  { %v2874_v10 = vpop.f32.mrf.mxu1  ;;  %3950 = vmatpush2.bf16.msra.mxu0 %v5702_v6  ;;  %v5744_v6 = vld [vmem:[#allocation7 + $0x1a8] ss:$16 sps:$4 sm:$0xff]  }
 0x20d   :  { %3951 = vmatprep.subr.bf16.mxu0 %v5707_v7  ;;  %3991 = vmatpush2.bf16.msra.mxu1 %v5798_v24  ;;  %v2875_v35 = vadd.f32 %v2874_v10, %v540_v32  ;;  %v5749_v7 = vld [vmem:[#allocation7 + $0x18c] ss:$16 sps:$4 sm:$0xff]   ;;  %v5747_v10 = vld [vmem:[#allocation7 + $0x188] ss:$16 sps:$4 sm:$0xff]  }
 0x20e   :  { %v2876_v12 = vpop.f32.mrf.mxu1  ;;  %3992 = vmatprep.subr.bf16.mxu1 %v5803_v27  ;;  %v5759_v24 = vld [vmem:[#allocation7 + $0x108] ss:$16 sps:$4 sm:$0xff]  }
 0x20f   :  { %v2877_v38 = vadd.f32 %v2876_v12, %v544_v30  ;;  %v5755_v12 = vld [vmem:[#allocation7 + $0x14c] ss:$16 sps:$4 sm:$0xff]  }
 0x210   :  { %v2878_v14 = vpop.f32.mrf.mxu1  ;;  %3952 = vmatpush2.bf16.msra.mxu0 %v5705_v11  ;;  %v5752_v11 = vld [vmem:[#allocation7 + $0x16c] ss:$16 sps:$4 sm:$0xff]  }
 0x211   :  { %3953 = vmatprep.subr.bf16.mxu0 %v5710_v13  ;;  %3993 = vmatpush2.bf16.msra.mxu1 %v5801_v62  ;;  %v5753_v14 = vld [vmem:[#allocation7 + $0x148] ss:$16 sps:$4 sm:$0xff]  }
 0x212   :  { %v2879_v18 = vpop.f32.mrf.mxu1  ;;  %3994 = vmatprep.subr.bf16.mxu1 %v5806_v44 }
 0x214   :  { %3954 = vmatpush2.bf16.msra.mxu0 %v5708_v15 }
 0x215   :  { %3955 = vmatprep.subr.bf16.mxu0 %v5713_v8  ;;  %3995 = vmatpush2.bf16.msra.mxu1 %v5804_v48  ;;  %v5756_v8 = vld [vmem:[#allocation7 + $0x128] ss:$16 sps:$4 sm:$0xff]  }
 0x216   :  { %3996 = vmatprep.subr.bf16.mxu1 %v5809_v16 }
 0x218   :  { %3956 = vmatpush2.bf16.msra.mxu0 %v5711_v26 }
 0x219   :  { %4007 = vmatprep.subr.bf16.mxu0 %v5716_v37  ;;  %3997 = vmatpush2.bf16.msra.mxu1 %v5807_v57  ;;  %v5859_v57 = vld [vmem:[%s6301_s5 + $0x38] sm:$0xff]  }
 0x21a   :  { %4048 = vmatprep.subr.bf16.mxu1 %v5812_v40 }
 0x21b   :  { %v2915_v36 = vpop.f32.mrf.mxu0  ;;  %3958 = vmatmul.mubr.bf16.vlgmr.msra.gmra.mxu0 %v6177_v33 }
 0x21c   :  { %v6180_v42 = vadd.f32 %v2915_v36, %v2875_v35  ;;  %4008 = vmatpush1.bf16.msra.mxu0 %v5714_v31  ;;  %4039 = vmatprep.mubr.bf16.mxu0 %v6166_v41  ;;  %v5723_v41 = vld [vmem:[#allocation7 + $0x88] ss:$16 sps:$4 sm:$0xff]  }
 0x21d   :  { %v2917_v45 = vpop.f32.mrf.mxu0  ;;  %4009 = vmatprep.subr.bf16.mxu0 %v5719_v34 }
 0x21e   :  { %v2918_v50 = vadd.f32 %v2917_v45, %v2877_v38 }
 0x21f   :  { %v2919_v9 = vpop.f32.mrf.mxu0 }
 0x220   :  { %4010 = vmatpush1.bf16.msra.mxu0 %v5717_v43 }
 0x221   :  { %v2920_v55 = vpop.f32.mrf.mxu0  ;;  %4011 = vmatprep.subr.bf16.mxu0 %v5722_v47 }
 0x224   :  { %4012 = vmatpush1.bf16.msra.mxu0 %v5720_v20 }
 0x225   :  { %4013 = vmatprep.subr.bf16.mxu0 %v5725_v56  ;;  %v5858_v56 = vld [vmem:[%s6301_s5 + $0x78] sm:$0xff]  }
 0x228   :  { %4014 = vmatpush1.bf16.msra.mxu0 %v5723_v41  ;;  %v5860_v41 = vld [vmem:[%s6301_s5 + $0x70] sm:$0xff]  }
 0x229   :  { %4015 = vmatprep.subr.bf16.mxu0 %v5728_v58 }
 0x22c   :  { %4016 = vmatpush1.bf16.msra.mxu0 %v5726_v19  ;;  %v5810_v19 = vld [vmem:[#allocation7 + $0x2e8] ss:$16 sps:$4 sm:$0xff]  }
 0x22d   :  { %4017 = vmatprep.subr.bf16.mxu0 %v5731_v60 }
 0x230   :  { %4018 = vmatpush1.bf16.msra.mxu0 %v5729_v29  ;;  %v5815_v29 = vld [vmem:[#allocation7 + $0x2cc] ss:$16 sps:$4 sm:$0xff]  }
 0x231   :  { %4019 = vmatprep.subr.bf16.mxu0 %v5734_v61  ;;  %v5861_v61 = vld [vmem:[%s6301_s5 + $0x30] sm:$0xff]  }
 0x234   :  { %4020 = vmatpush1.bf16.msra.mxu0 %v5732_v63  ;;  %v5862_v63 = vld [vmem:[%s6301_s5 + $0x68] sm:$0xff]  }
 0x235   :  { %4021 = vmatprep.subr.bf16.mxu0 %v5737_v0  ;;  %v5813_v0 = vld [vmem:[#allocation7 + $0x2c8] ss:$16 sps:$4 sm:$0xff]  }
 0x238   :  { %4022 = vmatpush1.bf16.msra.mxu0 %v5735_v1  ;;  %v5818_v1 = vld [vmem:[#allocation7 + $0x2ac] ss:$16 sps:$4 sm:$0xff]  }
 0x239   :  { %4023 = vmatprep.subr.bf16.mxu0 %v5740_v2  ;;  %v5863_v2 = vld [vmem:[%s6301_s5 + $0x28] sm:$0xff]  }
 0x23c   :  { %4024 = vmatpush2.bf16.msra.mxu0 %v5738_v4  ;;  %v5864_v4 = vld [vmem:[%s6301_s5 + $0x60] sm:$0xff]  }
 0x23d   :  { %4025 = vmatprep.subr.bf16.mxu0 %v5743_v5  ;;  %v5816_v5 = vld [vmem:[#allocation7 + $0x2a8] ss:$16 sps:$4 sm:$0xff]  }
 0x240   :  { %4026 = vmatpush2.bf16.msra.mxu0 %v5741_v39  ;;  %v5821_v39 = vld [vmem:[#allocation7 + $0x28c] ss:$16 sps:$4 sm:$0xff]  }
 0x241   :  { %4027 = vmatprep.subr.bf16.mxu0 %v5746_v46  ;;  %v5865_v46 = vld [vmem:[%s6301_s5 + $0x20] sm:$0xff]  }
 0x244   :  { %4028 = vmatpush2.bf16.msra.mxu0 %v5744_v6  ;;  %v5866_v6 = vld [vmem:[%s6301_s5 + $0x58] sm:$0xff]  }
 0x245   :  { %4029 = vmatprep.subr.bf16.mxu0 %v5749_v7  ;;  %v5819_v7 = vld [vmem:[#allocation7 + $0x288] ss:$16 sps:$4 sm:$0xff]  }
 0x248   :  { %4030 = vmatpush2.bf16.msra.mxu0 %v5747_v10  ;;  %v5824_v10 = vld [vmem:[#allocation7 + $0x26c] ss:$16 sps:$4 sm:$0xff]  }
 0x249   :  { %4031 = vmatprep.subr.bf16.mxu0 %v5752_v11  ;;  %v5867_v11 = vld [vmem:[%s6301_s5 + $0x18] sm:$0xff]  }
 0x24c   :  { %v2956_v13 = vpop.f32.mrf.mxu1  ;;  %4032 = vmatpush2.bf16.msra.mxu0 %v5750_v21  ;;  %v5868_v21 = vld [vmem:[%s6301_s5 + $0x50] sm:$0xff]  }
 0x24d   :  { %v2957_v51 = vadd.f32 %v2956_v13, %v6180_v42  ;;  %4033 = vmatprep.subr.bf16.mxu0 %v5755_v12  ;;  %v5822_v12 = vld [vmem:[#allocation7 + $0x268] ss:$16 sps:$4 sm:$0xff]   ;;  %v5827_v13 = vld [vmem:[#allocation7 + $0x24c] ss:$16 sps:$4 sm:$0xff]  }
 0x24e   :  { %v2958_v15 = vpop.f32.mrf.mxu1 }
 0x24f   :  { %v2959_v17 = vadd.f32 %v2958_v15, %v2918_v50  ;;  %v5830_v15 = vld [vmem:[#allocation7 + $0x22c] ss:$16 sps:$4 sm:$0xff]  }
 0x250   :  { %v2960_v18 = vpop.f32.mrf.mxu1  ;;  %4034 = vmatpush2.bf16.msra.mxu0 %v5753_v14  ;;  %v5825_v14 = vld [vmem:[#allocation7 + $0x248] ss:$16 sps:$4 sm:$0xff]  }
 0x251   :  { %4035 = vmatprep.subr.bf16.mxu0 %v5758_v52  ;;  %v5828_v52 = vld [vmem:[#allocation7 + $0x228] ss:$16 sps:$4 sm:$0xff]  }
 0x252   :  { %v2961_v22 = vpop.f32.mrf.mxu1  ;;  %v5831_v18 = vld [vmem:[#allocation7 + $0x208] ss:$16 sps:$4 sm:$0xff]  }
 0x253   :  { %v5834_v22 = vld [vmem:[#allocation7 + $0x3e8] ss:$16 sps:$4 sm:$0xff]  }
 0x254   :  { %4036 = vmatpush2.bf16.msra.mxu0 %v5756_v8  ;;  %v5836_v8 = vld [vmem:[#allocation7 + $0x3ec] ss:$16 sps:$4 sm:$0xff]  }
 0x255   :  { %4037 = vmatprep.subr.bf16.mxu0 %v5761_v54  ;;  %v5839_v54 = vld [vmem:[#allocation7 + $0x3cc] ss:$16 sps:$4 sm:$0xff]  }
 0x258   :  { %4038 = vmatpush2.bf16.msra.mxu0 %v5759_v24  ;;  %v5837_v24 = vld [vmem:[#allocation7 + $0x3c8] ss:$16 sps:$4 sm:$0xff]  }
 0x259   :  { %5013 = vmatprep.subr.bf16.mxu0 %v5858_v56  ;;  %v5879_v56 = vld [vmem:[%s6301_s5 + $0xa8] sm:$0xff]  }
 0x25b   :  { %v2997_v26 = vpop.f32.mrf.mxu0  ;;  %4040 = vmatmul.mubr.bf16.vlgmr.msra.gmra.mxu0 %v6177_v33 }
 0x25c   :  { %v2998_v31 = vadd.f32 %v2997_v26, %v2957_v51  ;;  %5014 = vmatpush3.bf16.msra.mxu0 %v5859_v57  ;;  %v5869_v51 = vld [vmem:[%s6301_s5 + $0x10] sm:$0xff]   ;;  %v5842_v26 = vld [vmem:[#allocation7 + $0x3ac] ss:$16 sps:$4 sm:$0xff]   ;;  %v5880_v57 = vld [vmem:[%s6301_s5 + $0xe0] sm:$0xff]  }
 0x25d   :  { %v2999_v27 = vpop.f32.mrf.mxu0  ;;  %5015 = vmatprep.subr.bf16.mxu0 %v5860_v41  ;;  %v5881_v41 = vld [vmem:[%s6301_s5 + $0xa0] sm:$0xff]  }
 0x25e   :  { %v3000_v34 = vadd.f32 %v2999_v27, %v2959_v17  ;;  %v5833_v17 = vld [vmem:[#allocation7 + $0x20c] ss:$16 sps:$4 sm:$0xff]   ;;  %v5840_v27 = vld [vmem:[#allocation7 + $0x3a8] ss:$16 sps:$4 sm:$0xff]  }
 0x25f   :  { %v3001_v28 = vpop.f32.mrf.mxu0 }
 0x260   :  { %5016 = vmatpush3.bf16.msra.mxu0 %v5861_v61  ;;  %v5845_v28 = vld [vmem:[#allocation7 + $0x38c] ss:$16 sps:$4 sm:$0xff]  }
 0x261   :  { %v3002_v37 = vpop.f32.mrf.mxu0  ;;  %5017 = vmatprep.subr.bf16.mxu0 %v5862_v63 }
 0x262   :  { %v5843_v37 = vld [vmem:[#allocation7 + $0x388] ss:$16 sps:$4 sm:$0xff]  }
 0x264   :  { %5018 = vmatpush3.bf16.msra.mxu0 %v5863_v2  ;;  %v5887_v2 = vld [vmem:[%s6301_s5 + $0x88] sm:$0xff]  }
 0x265   :  { %5019 = vmatprep.subr.bf16.mxu0 %v5864_v4  ;;  %v5888_v4 = vld [vmem:[%s6301_s5 + $0xc0] sm:$0xff]  }
 0x268   :  { %5020 = vmatpush3.bf16.msra.mxu0 %v5865_v46 }
 0x269   :  { %5021 = vmatprep.subr.bf16.mxu0 %v5866_v6 }
 0x26c   :  { %5022 = vmatpush3.bf16.msra.mxu0 %v5867_v11 }
 0x26d   :  { %5023 = vmatprep.subr.bf16.mxu0 %v5868_v21 }
 0x270   :  { %5024 = vmatpush3.bf16.msra.mxu0 %v5869_v51 }
 0x28c   :  { %v3038_v3 = vpop.f32.mrf.mxu1 }
 0x28d   :  { %v3039_v35 = vadd.f32 %v3038_v3, %v2998_v31  ;;  %v5848_v3 = vld [vmem:[#allocation7 + $0x36c] ss:$16 sps:$4 sm:$0xff]  }
 0x28e   :  { %v3040_v32 = vpop.f32.mrf.mxu1  ;;  %v5854_v31 = vld [vmem:[#allocation7 + $0x32c] ss:$16 sps:$4 sm:$0xff]  }
 0x28f   :  { %v3041_v42 = vadd.f32 %v3040_v32, %v3000_v34  ;;  %v5846_v32 = vld [vmem:[#allocation7 + $0x368] ss:$16 sps:$4 sm:$0xff]  }
 0x290   :  { %v3042_v62 = vpop.f32.mrf.mxu1 }
 0x291   :  { %v5851_v62 = vld [vmem:[#allocation7 + $0x34c] ss:$16 sps:$4 sm:$0xff]  }
 0x292   :  { %v3043_v30 = vpop.f32.mrf.mxu1 }
 0x293   :  { %v5849_v30 = vld [vmem:[#allocation7 + $0x348] ss:$16 sps:$4 sm:$0xff]  }
 0x29b   :  { %v3079_v36 = vpop.f32.mrf.mxu0 }
 0x29c   :  { %v3120_v38 = vpop.f32.mrf.mxu1  ;;  %v3080_v43 = vadd.f32 %v3079_v36, %v3039_v35  ;;  %v5852_v35 = vld [vmem:[#allocation7 + $0x328] ss:$16 sps:$4 sm:$0xff]  }
 0x29d   :  { %v3081_v44 = vpop.f32.mrf.mxu0 }
 0x29e   :  { %v3122_v45 = vpop.f32.mrf.mxu1  ;;  %v3121_v47 = vadd.f32 %v3120_v38, %v3080_v43  ;;  %v3082_v48 = vadd.f32 %v3081_v44, %v3041_v42  ;;  %v5857_v38 = vld [vmem:[#allocation7 + $0x30c] ss:$16 sps:$4 sm:$0xff]   ;;  %v5855_v43 = vld [vmem:[#allocation7 + $0x308] ss:$16 sps:$4 sm:$0xff]  }
 0x29f   :  { %v3083_v50 = vpop.f32.mrf.mxu0 }
 0x2a0   :  { %v3124_v33 = vpop.f32.mrf.mxu1  ;;  %v3123_v9 = vadd.f32 %v3122_v45, %v3082_v48  ;;  %v3129_v20 = vmax.f32 %v3121_v47, 0.0  ;;  %v5870_v45 = vld [vmem:[%s6301_s5 + $0x48] sm:$0xff]   ;;  %v5872_v48 = vld [vmem:[%s6301_s5 + $0x40] sm:$0xff]  }
 0x2a1   :  { %v3084_v16 = vpop.f32.mrf.mxu0  ;;  %v5871_v47 = vld [vmem:[%s6301_s5 + $0x8] sm:$0xff]   ;;  %5025 = vmatprep.subr.bf16.mxu0 %v5870_v45  ;;  %v5873_v50 = vld [vmem:[%s6301_s5] sm:$0xff]   ;;  %v5874_v33 = vld [vmem:[%s6301_s5 + $0xf8] sm:$0xff]  }
 0x2a2   :  { %v3125_v55 = vpop.f32.mrf.mxu1  ;;  %v3130_v40 = vmax.f32 %v3123_v9, 0.0  ;;  %v6194_v60 = vpack.c.bf16 %v3129_v20, %v3129_v20  ;;  %5026 = vmatpush3.bf16.msra.mxu0 %v5871_v47  ;;  %v5875_v9 = vld [vmem:[%s6301_s5 + $0xb8] sm:$0xff]   ;;  %v5876_v20 = vld [vmem:[%s6301_s5 + $0xf0] sm:$0xff]  }
 0x2a3   :  { %5027 = vmatprep.subr.bf16.mxu0 %v5872_v48  ;;  %v5877_v16 = vld [vmem:[%s6301_s5 + $0xb0] sm:$0xff]   ;;  %v5878_v55 = vld [vmem:[%s6301_s5 + $0xe8] sm:$0xff]  }
 0x2a4   :  { %v3134_v58 = vpack.c.bf16 %v3130_v40, %v3130_v40  ;;  %v5882_v40 = vld [vmem:[%s6301_s5 + $0xd8] sm:$0xff]  }
 0x2a6   :  { %3998 = vmatprep.mubr.bf16.mxu1 %v3134_v58  ;;  %5028 = vmatpush3.bf16.msra.mxu0 %v5873_v50 }
 0x2a7   :  { %3999 = vmatmul.mubr.bf16.vlgmr.msra.gmra.mxu1 %v6194_v60 }
 0x2a8   :  { %4049 = vmatpush1.bf16.msra.mxu1 %v5810_v19  ;;  %4080 = vmatprep.mubr.bf16.mxu1 %v3134_v58  ;;  %v5883_v58 = vld [vmem:[%s6301_s5 + $0x98] sm:$0xff]   ;;  %v5884_v19 = vld [vmem:[%s6301_s5 + $0xd0] sm:$0xff]  }
 0x2a9   :  { %4050 = vmatprep.subr.bf16.mxu1 %v5815_v29 }
 0x2ac   :  { %4051 = vmatpush1.bf16.msra.mxu1 %v5813_v0 }
 0x2ad   :  { %4052 = vmatprep.subr.bf16.mxu1 %v5818_v1  ;;  %v5886_v1 = vld [vmem:[%s6301_s5 + $0xc8] sm:$0xff]  }
 0x2b0   :  { %4053 = vmatpush1.bf16.msra.mxu1 %v5816_v5  ;;  %v5889_v5 = vld [vmem:[%s6301_s5 + $0x80] sm:$0xff]  }
 0x2b1   :  { %4054 = vmatprep.subr.bf16.mxu1 %v5821_v39  ;;  %v3263_v39 = vld [vmem:[#allocation9] sm:$0xf] }
 0x2b2   :  { %v3268_v46 = vrot.slane %v3263_v39, %v531_v59  ;;  %v3272_v6 = vrot.slane %v3263_v39, %v535_v49  ;;  %v3276_v59 = vrot.slane %v3263_v39, %v539_v23  ;;  %v3280_v49 = vrot.slane %v3263_v39, %v543_v25  ;;  %v4980_v25 = vld [vmem:[#allocation10] ss:$0 sm:$0xff] }
 0x2b4   :  { %4055 = vmatpush1.bf16.msra.mxu1 %v5819_v7 }
 0x2b5   :  { %4056 = vmatprep.subr.bf16.mxu1 %v5824_v10 }
 0x2b8   :  { %4057 = vmatpush1.bf16.msra.mxu1 %v5822_v12 }
 0x2b9   :  { %4058 = vmatprep.subr.bf16.mxu1 %v5827_v13 }
 0x2bc   :  { %4059 = vmatpush1.bf16.msra.mxu1 %v5825_v14 }
 0x2bd   :  { %4060 = vmatprep.subr.bf16.mxu1 %v5830_v15 }
 0x2c0   :  { %4061 = vmatpush1.bf16.msra.mxu1 %v5828_v52 }
 0x2c1   :  { %4062 = vmatprep.subr.bf16.mxu1 %v5833_v17 }
 0x2c4   :  { %4063 = vmatpush1.bf16.msra.mxu1 %v5831_v18 }
 0x2c5   :  { %4064 = vmatprep.subr.bf16.mxu1 %v5836_v8 }
 0x2c8   :  { %4065 = vmatpush2.bf16.msra.mxu1 %v5834_v22 }
 0x2c9   :  { %4066 = vmatprep.subr.bf16.mxu1 %v5839_v54 }
 0x2cc   :  { %4067 = vmatpush2.bf16.msra.mxu1 %v5837_v24 }
 0x2cd   :  { %4068 = vmatprep.subr.bf16.mxu1 %v5842_v26 }
 0x2d0   :  { %4069 = vmatpush2.bf16.msra.mxu1 %v5840_v27 }
 0x2d1   :  { %4070 = vmatprep.subr.bf16.mxu1 %v5845_v28 }
 0x2d4   :  { %4071 = vmatpush2.bf16.msra.mxu1 %v5843_v37 }
 0x2d5   :  { %4072 = vmatprep.subr.bf16.mxu1 %v5848_v3 }
 0x2d8   :  { %4073 = vmatpush2.bf16.msra.mxu1 %v5846_v32 }
 0x2d9   :  { %4074 = vmatprep.subr.bf16.mxu1 %v5851_v62 }
 0x2db   :  { %v3959_v34 = vpop.f32.mrf.mxu0 }
 0x2dc   :  { %4075 = vmatpush2.bf16.msra.mxu1 %v5849_v30  ;;  %v3960_v7 = vadd.f32 %v3959_v34, %v3268_v46 }
 0x2dd   :  { %v3961_v36 = vpop.f32.mrf.mxu0  ;;  %4076 = vmatprep.subr.bf16.mxu1 %v5854_v31 }
 0x2de   :  { %v3962_v11 = vadd.f32 %v3961_v36, %v3272_v6 }
 0x2df   :  { %v3963_v42 = vpop.f32.mrf.mxu0 }
 0x2e0   :  { %4077 = vmatpush2.bf16.msra.mxu1 %v5852_v35 }
 0x2e1   :  { %v3964_v44 = vpop.f32.mrf.mxu0  ;;  %4078 = vmatprep.subr.bf16.mxu1 %v5857_v38 }
 0x2e4   :  { %4079 = vmatpush2.bf16.msra.mxu1 %v5855_v43 }
 0x2e5   :  { %5035 = vmatprep.subr.bf16.mxu1 %v5874_v33 }
 0x2e7   :  { %4081 = vmatmul.mubr.bf16.vlgmr.msra.gmra.mxu1 %v6194_v60  ;;  %v5885_v60 = vld [vmem:[%s6301_s5 + $0x90] sm:$0xff]  }
 0x2e8   :  { %5036 = vmatpush3.bf16.msra.mxu1 %v5875_v9 }
 0x2e9   :  { %5037 = vmatprep.subr.bf16.mxu1 %v5876_v20 }
 0x2ec   :  { %5038 = vmatpush3.bf16.msra.mxu1 %v5877_v16 }
 0x2ed   :  { %5039 = vmatprep.subr.bf16.mxu1 %v5878_v55 }
 0x2f0   :  { %5040 = vmatpush3.bf16.msra.mxu1 %v5879_v56 }
 0x2f1   :  { %5041 = vmatprep.subr.bf16.mxu1 %v5880_v57 }
 0x2f4   :  { %5042 = vmatpush3.bf16.msra.mxu1 %v5881_v41 }
 0x2f5   :  { %5043 = vmatprep.subr.bf16.mxu1 %v5882_v40 }
 0x2f8   :  { %5044 = vmatpush3.bf16.msra.mxu1 %v5883_v58 }
 0x2f9   :  { %5045 = vmatprep.subr.bf16.mxu1 %v5884_v19 }
 0x2fc   :  { %5046 = vmatpush3.bf16.msra.mxu1 %v5885_v60 }
 0x2fd   :  { %5047 = vmatprep.subr.bf16.mxu1 %v5886_v1 }
 0x300   :  { %5048 = vmatpush3.bf16.msra.mxu1 %v5887_v2 }
 0x301   :  { %5049 = vmatprep.subr.bf16.mxu1 %v5888_v4 }
 0x304   :  { %5050 = vmatpush3.bf16.msra.mxu1 %v5889_v5 }
 0x31b   :  { %v4041_v29 = vpop.f32.mrf.mxu0 }
 0x31c   :  { %v4042_v8 = vadd.f32 %v4041_v29, %v3276_v59 }
 0x31d   :  { %v4043_v61 = vpop.f32.mrf.mxu0 }
 0x31e   :  { %v4044_v54 = vadd.f32 %v4043_v61, %v3280_v49 }
 0x31f   :  { %v4045_v63 = vpop.f32.mrf.mxu0 }
 0x321   :  { %v4046_v0 = vpop.f32.mrf.mxu0 }
 0x367   :  { %v4000_v10 = vpop.f32.mrf.mxu1 }
 0x368   :  { %v4001_v21 = vadd.f32 %v4000_v10, %v3960_v7 }
 0x369   :  { %v4002_v12 = vpop.f32.mrf.mxu1 }
 0x36a   :  { %v4003_v13 = vadd.f32 %v4002_v12, %v3962_v11  ;;  %v4089_v51 = vmax.f32 %v4001_v21, 0.0 }
 0x36b   :  { %v4004_v14 = vpop.f32.mrf.mxu1 }
 0x36c   :  { %v4090_v15 = vmax.f32 %v4003_v13, 0.0  ;;  %v4093_v18 = vpack.c.bf16 %v4089_v51, %v4089_v51 }
 0x36d   :  { %v4005_v52 = vpop.f32.mrf.mxu1 }
 0x36e   :  { %v4094_v17 = vpack.c.bf16 %v4090_v15, %v4090_v15 }
 0x370   :  { %4392 = vmatprep.mubr.bf16.mxu0 %v4094_v17 }
 0x371   :  { %4393 = vmatmul.mubr.bf16.vlgmr.msra.gmra.mxu0 %v4093_v18 }
 0x3a7   :  { %v4082_v22 = vpop.f32.mrf.mxu1 }
 0x3a8   :  { %v4083_v24 = vadd.f32 %v4082_v22, %v4042_v8 }
 0x3a9   :  { %v4084_v26 = vpop.f32.mrf.mxu1 }
 0x3aa   :  { %v4085_v27 = vadd.f32 %v4084_v26, %v4044_v54  ;;  %v4091_v28 = vmax.f32 %v4083_v24, 0.0 }
 0x3ab   :  { %v4086_v37 = vpop.f32.mrf.mxu1 }
 0x3ac   :  { %v4092_v3 = vmax.f32 %v4085_v27, 0.0  ;;  %v4095_v30 = vpack.c.bf16 %v4091_v28, %v4091_v28 }
 0x3ad   :  { %v4087_v32 = vpop.f32.mrf.mxu1 }
 0x3ae   :  { %v4096_v62 = vpack.c.bf16 %v4092_v3, %v4092_v3 }
 0x3b0   :  { %4432 = vmatprep.mubr.bf16.mxu1 %v4096_v62 }
 0x3b1   :  { %4433 = vmatmul.mubr.bf16.vlgmr.msra.gmra.mxu1 %v4095_v30 }
 0x431   :  { %v5029_v31 = vpop.f32.mrf.mxu0 }
 0x433   :  { %v5030_v34 = vpop.f32.mrf.mxu0 }
 0x434   :  { %v5031_v53 = vadd.f32 %v5030_v34, %v5029_v31 }
 0x435   :  { %v5032_v23 = vpop.f32.mrf.mxu0 }
 0x436   :  { %v4395_v42 = vadd.f32 %v5031_v53, %v4980_v25 }
 0x437   :  { %v5033_v35 = vpop.f32.mrf.mxu0 }
 0x471   :  { %v5051_v36 = vpop.f32.mrf.mxu1 }
 0x473   :  { %v5052_v38 = vpop.f32.mrf.mxu1 }
 0x474   :  { %v5053_v43 = vadd.f32 %v5052_v38, %v5051_v36 }
 0x475   :  { %v5054_v44 = vpop.f32.mrf.mxu1 }
 0x476   :  { %v4435_v45 = vadd.f32 %v5053_v43, %v4395_v42 }
 0x477   :  { %v5055_v47 = vpop.f32.mrf.mxu1 }
 0x478   :  { %4441 = vst.msk [vmem:[%s6303_s7] sm:$0xff] %vm4440_vm1, %v4435_v45 }
 0x479   :  { %4446 = vsyncpa [#allocation3], 1 }
 0x47a   :  { %4447 = vsyncpa [#allocation5], 1 }
 0x47b   :  { %4448 = vsyncpa [#allocation8], 1 }
 0x47c   :  { %4449 = vsyncpa [#allocation11], 1 }

</bundles_post_ra>
